<compile_context>
chip_gen: v6e
topology: v6e:2x2x1
jax: 0.10.0
libtpu: 0.0.40
codegen_flags: <defaults>
</compile_context>

<pallas_src>
import functools

import jax
import jax.numpy as jnp
import numpy as np
from jax.experimental import pallas as pl
from jax.experimental.pallas import tpu as pltpu


def _bilinear_matrix(n_in: int, n_out: int) -> np.ndarray:
    """(n_out, n_in) float64 matrix reproducing PyTorch bilinear, align_corners=False."""
    scale = n_in / n_out
    dst = np.arange(n_out, dtype=np.float64)
    src = np.maximum((dst + 0.5) * scale - 0.5, 0.0)    # PyTorch clamps negative src to 0
    i0 = np.clip(np.floor(src).astype(np.int64), 0, n_in - 1)
    i1 = np.minimum(i0 + 1, n_in - 1)
    lam = src - i0
    m = np.zeros((n_out, n_in), dtype=np.float64)
    rows = np.arange(n_out)
    np.add.at(m, (rows, i0), 1.0 - lam)
    np.add.at(m, (rows, i1), lam)                       # i0 == i1 -> weights still sum to 1
    return m


def _fused_interp_matrix(h: int, w: int, h_out: int, w_out: int) -> np.ndarray:
    """K[(h,w),(o,p)] = M_h[o,h] * M_w[p,w], shape (H*W, H_out*W_out), float32."""
    m_h = _bilinear_matrix(h, h_out)
    m_w = _bilinear_matrix(w, w_out)
    k = np.einsum("oh,pw->hwop", m_h, m_w).reshape(h * w, h_out * w_out)
    return k.astype(np.float32)


def _interp_kernel(k_ref, x_ref, o_ref, *, num_splits: int):
    """out_block = x_block @ K for a block of flattened (n, c) planes.

    num_splits == 1: one MXU pass in the storage dtype of x / K.
    num_splits == 3: x is f32 and K is exactly representable in bf16, so x is
        split into three bf16 pieces and accumulated in f32 over three bf16 MXU
        passes (f32-class accuracy, ~half the MXU cost of precision=HIGHEST).
    """
    k = k_ref[...]
    if num_splits == 1:
        acc = jnp.dot(x_ref[...], k, preferred_element_type=jnp.float32)
    else:
        x = x_ref[...]
        hi = x.astype(jnp.bfloat16)
        rem = x - hi.astype(jnp.float32)                # exact in f32
        mid = rem.astype(jnp.bfloat16)
        lo = (rem - mid.astype(jnp.float32)).astype(jnp.bfloat16)
        acc = jnp.dot(hi, k, preferred_element_type=jnp.float32)
        acc = acc + jnp.dot(mid, k, preferred_element_type=jnp.float32)
        acc = acc + jnp.dot(lo, k, preferred_element_type=jnp.float32)
    o_ref[...] = acc.astype(o_ref.dtype)


def _pick_block_planes(nc: int, plane_in: int, plane_out: int, itemsize: int) -> int:
    """Planes per grid step: ~8 MiB of in+out traffic, multiple of 256, >=2 steps
    when there is enough work so both v7x TensorCores get a share."""
    per_plane = (plane_in + plane_out) * max(itemsize, 1)
    b = (8 * 1024 * 1024) // per_plane
    b = max((b // 256) * 256, 256)
    if nc <= 256:
        return nc                                       # tiny problem: one full-extent block
    if b >= nc:
        b = max(((nc + 511) // 512) * 256, 256)         # split in two for megacore
    return min(b, nc)


@functools.partial(jax.jit, static_argnames=("scale_factor",))
def interpolate_bilinear(x: jnp.ndarray, scale_factor: int = 2) -> jnp.ndarray:
    """Equivalent of Interpolate(scale_factor).forward(x) for NCHW input."""
    if x.ndim != 4:
        raise ValueError(f"expected NCHW input, got shape {x.shape}")
    n, c, h, w = x.shape
    h_out, w_out = h * scale_factor, w * scale_factor
    nc, plane_in, plane_out = n * c, h * w, h_out * w_out
    itemsize = jnp.dtype(x.dtype).itemsize

    # Fused interpolation matrix (host numpy -> baked compile-time constant).
    k_f32 = _fused_interp_matrix(h, w, h_out, w_out)
    k_bf16 = k_f32.astype(jnp.bfloat16)
    k_exact_in_bf16 = bool(np.array_equal(k_bf16.astype(np.float32), k_f32))

    if x.dtype == jnp.bfloat16:
        k_np, num_splits = k_bf16, 1                    # native bf16 MXU path
    elif x.dtype == jnp.float32 and k_exact_in_bf16:
        k_np, num_splits = k_bf16, 3                    # 3x bf16 passes, f32-class accuracy
    else:
        # TODO(synk): separable two-matmul / 4-tap VPU path (dense fused-K f32 is
        # MXU-bound on v5e and needed for scales whose weights are not bf16-exact).
        k_np, num_splits = k_f32.astype(x.dtype), 1

    k_bytes = int(k_np.size) * int(np.dtype(k_np.dtype).itemsize)
    if k_bytes > 6 * 1024 * 1024:
        # TODO(synk): separable two-matmul variant once the fused K outgrows VMEM.
        raise NotImplementedError(
            f"fused interpolation matrix too large for VMEM ({k_bytes} bytes)")

    x2d = x.reshape(nc, plane_in)                       # contiguous (free) reshape
    b = _pick_block_planes(nc, plane_in, plane_out, itemsize)
    num_blocks = pl.cdiv(nc, b)                         # ragged last block: Pallas masks
                                                        # OOB output rows on writeback

    vmem_need = (2 * b * (plane_in + plane_out) * itemsize   # double-buffered x/out blocks
                 + 2 * k_bytes                               # K (+ its pipeline buffer)
                 + 8 * 1024 * 1024)                          # kernel temporaries / slack
    vmem_limit = int(min(max(vmem_need, 32 * 1024 * 1024), 48 * 1024 * 1024))

    out2d = pl.pallas_call(
        functools.partial(_interp_kernel, num_splits=num_splits),
        out_shape=jax.ShapeDtypeStruct((nc, plane_out), x.dtype),
        grid_spec=pltpu.PrefetchScalarGridSpec(
            num_scalar_prefetch=0,
            grid=(num_blocks,),
            in_specs=[
                # Constant block index -> DMA'd once, stays VMEM-resident.
                pl.BlockSpec((plane_in, plane_out), lambda i: (0, 0)),
                # B planes per step; lane axis = H*W (dense).
                pl.BlockSpec((b, plane_in), lambda i: (i, 0)),
            ],
            out_specs=pl.BlockSpec((b, plane_out), lambda i: (i, 0)),
        ),
        compiler_params=pltpu.CompilerParams(
            dimension_semantics=("parallel",),
            vmem_limit_bytes=vmem_limit,
        ),
        cost_estimate=pl.CostEstimate(
            flops=int(8 * nc * plane_out),              # true 4-tap bilinear work
            transcendentals=0,
            bytes_accessed=int(nc * (plane_in + plane_out) * itemsize + k_bytes),
        ),
    )(jnp.asarray(k_np), x2d)

    return out2d.reshape(n, c, h_out, w_out)


if __name__ == "__main__":
    key = jax.random.PRNGKey(0)
    x = jax.random.normal(key, (2, 4, 16, 16), dtype=jnp.float32)   # NCHW

    out = jax.block_until_ready(interpolate_bilinear(x, scale_factor=2))
    assert out.shape == (2, 4, 32, 32), out.shape

    # Exact float64 host reference (independent of TPU matmul precision).
    m_h = _bilinear_matrix(16, 32)
    m_w = _bilinear_matrix(16, 32)
    ref = np.einsum("oh,nchw,pw->ncop", m_h, np.asarray(x, np.float64), m_w)
    err = float(np.max(np.abs(np.asarray(out, np.float64) - ref)))
    assert np.allclose(np.asarray(out, np.float64), ref, atol=1e-5, rtol=1e-5), err

    # Native bf16 path (bf16 activations + bf16 K): looser tolerance by design.
    out_bf16 = jax.block_until_ready(
        interpolate_bilinear(x.astype(jnp.bfloat16), scale_factor=2))
    assert out_bf16.dtype == jnp.bfloat16
    assert np.allclose(np.asarray(out_bf16, np.float64), ref, atol=5e-2, rtol=5e-2)

    print("KERNEL_OK")
</pallas_src>

<mosaic_0001>
module attributes {stable_mosaic.version = 11 : i64} {
  func.func @_interp_kernel(%arg0: i32, %arg1: memref<256x1024xbf16, #tpu.memory_space<vmem>>, %arg2: memref<8x256xf32, #tpu.memory_space<vmem>>, %arg3: memref<8x1024xf32, #tpu.memory_space<vmem>>) attributes {dimension_semantics = [#tpu.dimension_semantics<parallel>], iteration_bounds = array<i64: 1>, scalar_prefetch = 0 : i64, scratch_operands = 0 : i64, tpu.core_type = #tpu.core_type<tc>, window_params = [{pipeline_mode = #tpu.pipeline_mode<synchronous>, transform_indices = @transform_0, window_bounds = array<i64: 256, 1024>}, {transform_indices = @transform_1, window_bounds = array<i64: 8, 256>}, {transform_indices = @transform_2, window_bounds = array<i64: 8, 1024>}]} {
    %c0 = arith.constant 0 : index
    %c0_0 = arith.constant 0 : index
    %0 = vector.load %arg1[%c0, %c0_0] : memref<256x1024xbf16, #tpu.memory_space<vmem>>, vector<256x1024xbf16>
    %c0_1 = arith.constant 0 : index
    %c0_2 = arith.constant 0 : index
    %1 = vector.load %arg2[%c0_1, %c0_2] : memref<8x256xf32, #tpu.memory_space<vmem>>, vector<8x256xf32>
    %2 = arith.truncf %1 : vector<8x256xf32> to vector<8x256xbf16>
    %3 = arith.extf %2 : vector<8x256xbf16> to vector<8x256xf32>
    %4 = arith.subf %1, %3 : vector<8x256xf32>
    %5 = arith.truncf %4 : vector<8x256xf32> to vector<8x256xbf16>
    %6 = arith.extf %5 : vector<8x256xbf16> to vector<8x256xf32>
    %7 = arith.subf %4, %6 : vector<8x256xf32>
    %8 = arith.truncf %7 : vector<8x256xf32> to vector<8x256xbf16>
    %cst = arith.constant dense<0.000000e+00> : vector<8x1024xf32>
    %9 = tpu.matmul %2, %0, %cst {dimension_numbers = #tpu.dot_dimension_numbers<[1], [0], [0], [1], [0, 0, 1, 1], [], []>} : vector<8x256xbf16>, vector<256x1024xbf16>, vector<8x1024xf32> -> vector<8x1024xf32>
    %cst_3 = arith.constant dense<0.000000e+00> : vector<8x1024xf32>
    %10 = tpu.matmul %5, %0, %cst_3 {dimension_numbers = #tpu.dot_dimension_numbers<[1], [0], [0], [1], [0, 0, 1, 1], [], []>} : vector<8x256xbf16>, vector<256x1024xbf16>, vector<8x1024xf32> -> vector<8x1024xf32>
    %11 = arith.addf %9, %10 : vector<8x1024xf32>
    %cst_4 = arith.constant dense<0.000000e+00> : vector<8x1024xf32>
    %12 = tpu.matmul %8, %0, %cst_4 {dimension_numbers = #tpu.dot_dimension_numbers<[1], [0], [0], [1], [0, 0, 1, 1], [], []>} : vector<8x256xbf16>, vector<256x1024xbf16>, vector<8x1024xf32> -> vector<8x1024xf32>
    %13 = arith.addf %11, %12 : vector<8x1024xf32>
    %c0_5 = arith.constant 0 : index
    %c0_6 = arith.constant 0 : index
    %14 = vector.load %arg3[%c0_5, %c0_6] : memref<8x1024xf32, #tpu.memory_space<vmem>>, vector<8x1024xf32>
    tpu.vector_store %arg3[%c0_5, %c0_6], %13 {strides = array<i32>} : memref<8x1024xf32, #tpu.memory_space<vmem>>, vector<8x1024xf32>,
    return
  }
  func.func @transform_0(%arg0: i32) -> (i32, i32) {
    %c0_i32 = arith.constant 0 : i32
    %c0_i32_0 = arith.constant 0 : i32
    %c0_i32_1 = arith.constant 0 : i32
    return %c0_i32, %c0_i32_0 : i32, i32
  }
  func.func @transform_1(%arg0: i32) -> (i32, i32) {
    %c0_i32 = arith.constant 0 : i32
    %c0_i32_0 = arith.constant 0 : i32
    return %arg0, %c0_i32 : i32, i32
  }
  func.func @transform_2(%arg0: i32) -> (i32, i32) {
    %c0_i32 = arith.constant 0 : i32
    %c0_i32_0 = arith.constant 0 : i32
    return %arg0, %c0_i32 : i32, i32
  }
}

</mosaic_0001>

<bundles_post_ra>
// kernel: interpolate_bilinear.1
= control target key start
LH: loop header
LB: loop body
LE: loop exit
PB: predicated region body
PF: predicated region fallthrough
CT: control target
= control target key end

     0   :  { %7 = vsyncpa [#allocation3], 0  ;;  %s1475_s9 = smov [#allocation2]   ;;  %s2240_s0 = inlined_call_operand.hbm [shape: bf16[256,1024], index: 0, kind: input, shape index: {}]   ;;  %s2241_s1 = inlined_call_operand.vmem [shape: f32[8,256], index: 1, kind: input, shape index: {}]   ;;  %s2242_s2 = inlined_call_operand.vmem [shape: f32[8,1024], index: 2, kind: output, shape index: {}]  }
   0x1   :  { %s13_s10 = sshll.u32 %s1475_s9, 4  ;;  %s14_s10 = int_to_ptr.vmem [resolvable:$true] %s13_s10 }
   0x2   :  { %s1461_s11 = scalar_lea.vmem %s14_s10, 16384  ;;  %p1466_p1 = scmp.lt.s32.totalorder %s14_s10, %s14_s10 }
   0x3   :  { %p1462_p0 = scmp.ne.s32.totalorder %s14_s10, %s1461_s11  ;;  %p1467_p2 = scmp.lt.s32.totalorder %s1461_s11, %s1461_s11 }
   0x5   :  { %p1468_p3 = por %p1467_p2, %p1466_p1 }
   0x7   :  { %p1469_p4 = pnand %p1468_p3, %p1462_p0 }
   0x9   :  { %1472 = shalt.err (!%p1469_p4)
}
   0xa   :  { %s1476_s12 = smov 512   ;;  %s1477_s13 = smov 32  }
   0xb   :  { %19 = dma.hbm_to_vmem [thread:$0]  %s2240_s0, 16384, %s14_s10, [#allocation3], %s1476_s12, %s1476_s12, %s1477_s13  }
   0xc   :  { %1473 = dma.done.wait [#allocation3], 16384  }
   0xd   :  { %1474 = vsyncadd [#allocation3], 4294950912  ;;  %v81_v0 = vld [vmem:[#allocation2 + $0x1c0] sm:$0xff]  ;;  %v82_v2 = vld [vmem:[#allocation2 + $0x1c8] sm:$0xff] }
   0xe   :  { %v85_v1 = vld [vmem:[#allocation2 + $0x1e0] sm:$0xff]  ;;  %v86_v4 = vld [vmem:[#allocation2 + $0x1e8] sm:$0xff] }
   0xf   :  { %v1496_v3 = vcombine.high %v81_v0, %v85_v1  ;;  %v1498_v5 = vcombine.low %v81_v0, %v85_v1  ;;  %v73_v6 = vld [vmem:[#allocation2 + $0x180] sm:$0xff]  ;;  %v1500_v8 = vcombine.high %v82_v2, %v86_v4  ;;  %v1502_v9 = vcombine.low %v82_v2, %v86_v4  ;;  %v74_v11 = vld [vmem:[#allocation2 + $0x188] sm:$0xff] }
  0x10   :  { %v77_v7 = vld [vmem:[#allocation2 + $0x1a0] sm:$0xff]  ;;  %v78_v12 = vld [vmem:[#allocation2 + $0x1a8] sm:$0xff] }
  0x11   :  { %v1504_v10 = vcombine.high %v73_v6, %v77_v7  ;;  %v65_v13 = vld [vmem:[#allocation2 + $0x140] sm:$0xff]  ;;  %809 = vmatprep.subr.bf16.mxu0 %v1496_v3  ;;  %v1507_v14 = vcombine.high %v74_v11, %v78_v12  ;;  %v66_v16 = vld [vmem:[#allocation2 + $0x148] sm:$0xff]  ;;  %850 = vmatprep.subr.bf16.mxu1 %v1500_v8  ;;  %v1511_v18 = vcombine.low %v73_v6, %v77_v7 }
  0x12   :  { %v69_v15 = vld [vmem:[#allocation2 + $0x160] sm:$0xff]  ;;  %v70_v17 = vld [vmem:[#allocation2 + $0x168] sm:$0xff]  ;;  %810 = vmatpush1.bf16.msra.mxu0 %v1498_v5  ;;  %851 = vmatpush1.bf16.msra.mxu1 %v1502_v9  ;;  %v1515_v19 = vcombine.low %v74_v11, %v78_v12 }
  0x13   :  { %811 = vmatprep.subr.bf16.mxu0 %v1504_v10  ;;  %v1517_v20 = vcombine.high %v65_v13, %v69_v15  ;;  %852 = vmatprep.subr.bf16.mxu1 %v1507_v14  ;;  %v1520_v21 = vcombine.high %v66_v16, %v70_v17  ;;  %v57_v22 = vld [vmem:[#allocation2 + $0x100] sm:$0xff]  ;;  %v58_v24 = vld [vmem:[#allocation2 + $0x108] sm:$0xff]  ;;  %v1523_v26 = vcombine.low %v65_v13, %v69_v15 }
  0x14   :  { %v61_v23 = vld [vmem:[#allocation2 + $0x120] sm:$0xff]  ;;  %v62_v25 = vld [vmem:[#allocation2 + $0x128] sm:$0xff]  ;;  %v1527_v27 = vcombine.low %v66_v16, %v70_v17 }
  0x15   :  { %v1529_v28 = vcombine.high %v57_v22, %v61_v23  ;;  %v1532_v29 = vcombine.high %v58_v24, %v62_v25  ;;  %v49_v30 = vld [vmem:[#allocation2 + $0xc0] sm:$0xff]  ;;  %v50_v32 = vld [vmem:[#allocation2 + $0xc8] sm:$0xff]  ;;  %v1535_v34 = vcombine.low %v57_v22, %v61_v23  ;;  %v1539_v35 = vcombine.low %v58_v24, %v62_v25 }
  0x16   :  { %812 = vmatpush1.bf16.msra.mxu0 %v1511_v18  ;;  %853 = vmatpush1.bf16.msra.mxu1 %v1515_v19  ;;  %v53_v31 = vld [vmem:[#allocation2 + $0xe0] sm:$0xff]  ;;  %v54_v33 = vld [vmem:[#allocation2 + $0xe8] sm:$0xff] }
  0x17   :  { %813 = vmatprep.subr.bf16.mxu0 %v1517_v20  ;;  %854 = vmatprep.subr.bf16.mxu1 %v1520_v21  ;;  %v1541_v36 = vcombine.high %v49_v30, %v53_v31  ;;  %v1544_v37 = vcombine.high %v50_v32, %v54_v33  ;;  %v41_v38 = vld [vmem:[#allocation2 + $0x80] sm:$0xff]  ;;  %v42_v40 = vld [vmem:[#allocation2 + $0x88] sm:$0xff]  ;;  %v1547_v42 = vcombine.low %v49_v30, %v53_v31 }
  0x18   :  { %v45_v39 = vld [vmem:[#allocation2 + $0xa0] sm:$0xff]  ;;  %v46_v41 = vld [vmem:[#allocation2 + $0xa8] sm:$0xff]  ;;  %v1551_v43 = vcombine.low %v50_v32, %v54_v33 }
  0x19   :  { %v1553_v44 = vcombine.high %v41_v38, %v45_v39  ;;  %v1556_v45 = vcombine.high %v42_v40, %v46_v41  ;;  %v33_v46 = vld [vmem:[#allocation2 + $0x40] sm:$0xff]  ;;  %v34_v48 = vld [vmem:[#allocation2 + $0x48] sm:$0xff]  ;;  %v1559_v50 = vcombine.low %v41_v38, %v45_v39  ;;  %v1563_v51 = vcombine.low %v42_v40, %v46_v41 }
  0x1a   :  { %814 = vmatpush1.bf16.msra.mxu0 %v1523_v26  ;;  %855 = vmatpush1.bf16.msra.mxu1 %v1527_v27  ;;  %v37_v47 = vld [vmem:[#allocation2 + $0x60] sm:$0xff]  ;;  %v38_v49 = vld [vmem:[#allocation2 + $0x68] sm:$0xff] }
  0x1b   :  { %815 = vmatprep.subr.bf16.mxu0 %v1529_v28  ;;  %856 = vmatprep.subr.bf16.mxu1 %v1532_v29  ;;  %v1565_v52 = vcombine.high %v33_v46, %v37_v47  ;;  %v154_v53 = vld [vmem:[%s2241_s1 + $0x8] sm:$0xff]  ;;  %v1571_v54 = vcombine.high %v34_v48, %v38_v49  ;;  %v25_v55 = vld [vmem:[#allocation2] sm:$0xff]  ;;  %v1576_v60 = vcombine.low %v33_v46, %v37_v47 }
  0x1c   :  { %v29_v56 = vld [vmem:[#allocation2 + $0x20] sm:$0xff]  ;;  %v1573_v57 = vpack.c.bf16 %v154_v53, %v154_v53  ;;  %v26_v58 = vld [vmem:[#allocation2 + $0x8] sm:$0xff]  ;;  %v1581_v62 = vcombine.low %v34_v48, %v38_v49 }
  0x1d   :  { %v30_v59 = vld [vmem:[#allocation2 + $0x28] sm:$0xff]  ;;  %v1583_v63 = vcombine.high %v25_v55, %v29_v56  ;;  %v145_v1 = vld [vmem:[#allocation2 + $0x3c0] sm:$0xff]  ;;  %v1591_v11 = vcombine.low %v25_v55, %v29_v56 }
  0x1e   :  { %816 = vmatpush1.bf16.msra.mxu0 %v1535_v34  ;;  %857 = vmatpush1.bf16.msra.mxu1 %v1539_v35  ;;  %v158_v61 = vunpack.c.l.bf16 %v1573_v57  ;;  %v1586_v0 = vcombine.high %v26_v58, %v30_v59  ;;  %v149_v2 = vld [vmem:[#allocation2 + $0x3e0] sm:$0xff]  ;;  %v146_v6 = vld [vmem:[#allocation2 + $0x3c8] sm:$0xff]  ;;  %v1599_v13 = vcombine.low %v26_v58, %v30_v59 }
  0x1f   :  { %817 = vmatprep.subr.bf16.mxu0 %v1541_v36  ;;  %858 = vmatprep.subr.bf16.mxu1 %v1544_v37  ;;  %v150_v7 = vld [vmem:[#allocation2 + $0x3e8] sm:$0xff]  ;;  %v1601_v15 = vcombine.high %v145_v1, %v149_v2  ;;  %v137_v17 = vld [vmem:[#allocation2 + $0x380] sm:$0xff]  ;;  %v1609_v25 = vcombine.low %v145_v1, %v149_v2 }
  0x20   :  { %v1588_v4 = vsub.f32 %v154_v53, %v158_v61  ;;  %v1604_v16 = vcombine.high %v146_v6, %v150_v7  ;;  %v141_v22 = vld [vmem:[#allocation2 + $0x3a0] sm:$0xff]  ;;  %v138_v23 = vld [vmem:[#allocation2 + $0x388] sm:$0xff]  ;;  %v1613_v30 = vcombine.low %v146_v6, %v150_v7 }
  0x21   :  { %v142_v24 = vld [vmem:[#allocation2 + $0x3a8] sm:$0xff]  ;;  %v1615_v31 = vcombine.high %v137_v17, %v141_v22  ;;  %v129_v33 = vld [vmem:[#allocation2 + $0x340] sm:$0xff]  ;;  %v1621_v41 = vcombine.low %v137_v17, %v141_v22 }
  0x22   :  { %818 = vmatpush1.bf16.msra.mxu0 %v1547_v42  ;;  %859 = vmatpush1.bf16.msra.mxu1 %v1551_v43  ;;  %2403 = vst [vmem:[#allocation5_spill] sm:$0xff] %v1588_v4  ;;  %v1595_v12 = vpack.c.bf16 %v1588_v4, %v1588_v4  ;;  %v1618_v32 = vcombine.high %v138_v23, %v142_v24  ;;  %v133_v38 = vld [vmem:[#allocation2 + $0x360] sm:$0xff]  ;;  %v130_v39 = vld [vmem:[#allocation2 + $0x348] sm:$0xff] }
  0x23   :  { %819 = vmatprep.subr.bf16.mxu0 %v1553_v44  ;;  %860 = vmatprep.subr.bf16.mxu1 %v1556_v45  ;;  %v134_v40 = vld [vmem:[#allocation2 + $0x368] sm:$0xff]  ;;  %2406 = vst [vmem:[#allocation8_spill] sm:$0xff] %v1621_v41  ;;  %v1625_v46 = vcombine.low %v138_v23, %v142_v24  ;;  %v1627_v47 = vcombine.high %v129_v33, %v133_v38  ;;  %v121_v49 = vld [vmem:[#allocation2 + $0x300] sm:$0xff] }
  0x24   :  { %2404 = vst [vmem:[#allocation6_spill] sm:$0xff] %v1595_v12  ;;  %841 = vmatprep.mubr.bf16.mxu0 %v1595_v12  ;;  %882 = vmatprep.mubr.bf16.mxu1 %v1595_v12  ;;  %2405 = vst [vmem:[#allocation7_spill] sm:$0xff] %v1618_v32  ;;  %v1630_v48 = vcombine.high %v130_v39, %v134_v40  ;;  %v125_v53 = vld [vmem:[#allocation2 + $0x320] sm:$0xff]  ;;  %v122_v55 = vld [vmem:[#allocation2 + $0x308] sm:$0xff]  ;;  %v1633_v58 = vcombine.low %v129_v33, %v133_v38 }
  0x25   :  { %2407 = vst [vmem:[#allocation9_spill] sm:$0xff] %v1625_v46  ;;  %2408 = vst [vmem:[#allocation10_spill] sm:$0xff] %v1627_v47  ;;  %v126_v56 = vld [vmem:[#allocation2 + $0x328] sm:$0xff]  ;;  %v1637_v59 = vcombine.low %v130_v39, %v134_v40  ;;  %v1639_v61 = vcombine.high %v121_v49, %v125_v53  ;;  %v113_v2 = vld [vmem:[#allocation2 + $0x2c0] sm:$0xff]  ;;  %v1645_v22 = vcombine.low %v121_v49, %v125_v53 }
  0x26   :  { %820 = vmatpush1.bf16.msra.mxu0 %v1559_v50  ;;  %861 = vmatpush1.bf16.msra.mxu1 %v1563_v51  ;;  %2409 = vst [vmem:[#allocation11_spill] sm:$0xff] %v1630_v48  ;;  %2410 = vst [vmem:[#allocation12_spill] sm:$0xff] %v1633_v58  ;;  %v1642_v1 = vcombine.high %v122_v55, %v126_v56  ;;  %v117_v6 = vld [vmem:[#allocation2 + $0x2e0] sm:$0xff]  ;;  %v114_v7 = vld [vmem:[#allocation2 + $0x2c8] sm:$0xff]  ;;  %v1649_v23 = vcombine.low %v122_v55, %v126_v56 }
  0x27   :  { %821 = vmatprep.subr.bf16.mxu0 %v1565_v52  ;;  %862 = vmatprep.subr.bf16.mxu1 %v1571_v54  ;;  %2411 = vst [vmem:[#allocation13_spill] sm:$0xff] %v1637_v59  ;;  %2412 = vst [vmem:[#allocation14_spill] sm:$0xff] %v1639_v61  ;;  %v118_v17 = vld [vmem:[#allocation2 + $0x2e8] sm:$0xff]  ;;  %v1651_v24 = vcombine.high %v113_v2, %v117_v6  ;;  %v105_v38 = vld [vmem:[#allocation2 + $0x280] sm:$0xff]  ;;  %v1657_v49 = vcombine.low %v113_v2, %v117_v6 }
  0x28   :  { %2413 = vst [vmem:[#allocation15_spill] sm:$0xff] %v1642_v1  ;;  %2414 = vst [vmem:[#allocation16_spill] sm:$0xff] %v1645_v22  ;;  %v1654_v33 = vcombine.high %v114_v7, %v118_v17  ;;  %v109_v39 = vld [vmem:[#allocation2 + $0x2a0] sm:$0xff]  ;;  %v106_v40 = vld [vmem:[#allocation2 + $0x288] sm:$0xff]  ;;  %v1664_v55 = vcombine.low %v114_v7, %v118_v17 }
  0x29   :  { %2415 = vst [vmem:[#allocation17_spill] sm:$0xff] %v1649_v23  ;;  %2416 = vst [vmem:[#allocation18_spill] sm:$0xff] %v1651_v24  ;;  %v110_v4 = vld [vmem:[#allocation2 + $0x2a8] sm:$0xff]  ;;  %v153_v53 = vld [vmem:[%s2241_s1] sm:$0xff]  ;;  %v1666_v56 = vcombine.high %v105_v38, %v109_v39 }
  0x2a   :  { %822 = vmatpush1.bf16.msra.mxu0 %v1576_v60  ;;  %863 = vmatpush1.bf16.msra.mxu1 %v1581_v62  ;;  %2417 = vst [vmem:[#allocation19_spill] sm:$0xff] %v1654_v33  ;;  %2418 = vst [vmem:[#allocation20_spill] sm:$0xff] %v1657_v49  ;;  %v98_v2 = vld [vmem:[#allocation2 + $0x248] sm:$0xff]  ;;  %v1678_v7 = vcombine.low %v106_v40, %v110_v4 }
  0x2b   :  { %823 = vmatprep.subr.bf16.mxu0 %v1583_v63  ;;  %864 = vmatprep.subr.bf16.mxu1 %v1586_v0  ;;  %2419 = vst [vmem:[#allocation21_spill] sm:$0xff] %v1664_v55  ;;  %2420 = vst [vmem:[#allocation22_spill] sm:$0xff] %v1666_v56  ;;  %v102_v6 = vld [vmem:[#allocation2 + $0x268] sm:$0xff] }
  0x2c   :  { %2424 = vst [vmem:[#allocation26_spill] sm:$0xff] %v1678_v7 }
  0x2e   :  { %824 = vmatpush1.bf16.msra.mxu0 %v1591_v11  ;;  %865 = vmatpush1.bf16.msra.mxu1 %v1599_v13 }
  0x2f   :  { %825 = vmatprep.subr.bf16.mxu0 %v1601_v15  ;;  %866 = vmatprep.subr.bf16.mxu1 %v1604_v16 }
  0x32   :  { %826 = vmatpush2.bf16.msra.mxu0 %v1609_v25  ;;  %867 = vmatpush2.bf16.msra.mxu1 %v1613_v30 }
  0x33   :  { %827 = vmatprep.subr.bf16.mxu0 %v1615_v31  ;;  %868 = vmatprep.subr.bf16.mxu1 %v1618_v32 }
  0x36   :  { %828 = vmatpush2.bf16.msra.mxu0 %v1621_v41  ;;  %869 = vmatpush2.bf16.msra.mxu1 %v1625_v46 }
  0x37   :  { %829 = vmatprep.subr.bf16.mxu0 %v1627_v47  ;;  %870 = vmatprep.subr.bf16.mxu1 %v1630_v48  ;;  %v90_v48 = vld [vmem:[#allocation2 + $0x208] sm:$0xff] }
  0x38   :  { %v94_v47 = vld [vmem:[#allocation2 + $0x228] sm:$0xff] }
  0x3a   :  { %830 = vmatpush2.bf16.msra.mxu0 %v1633_v58  ;;  %871 = vmatpush2.bf16.msra.mxu1 %v1637_v59  ;;  %v1671_v59 = vpack.c.bf16 %v153_v53, %v153_v53  ;;  %v1674_v58 = vcombine.low %v105_v38, %v109_v39 }
  0x3b   :  { %831 = vmatprep.subr.bf16.mxu0 %v1639_v61  ;;  %872 = vmatprep.subr.bf16.mxu1 %v1642_v1  ;;  %v1669_v1 = vcombine.high %v106_v40, %v110_v4  ;;  %v97_v61 = vld [vmem:[#allocation2 + $0x240] sm:$0xff]  ;;  %v1691_v4 = vcombine.low %v98_v2, %v102_v6  ;;  %v1696_v40 = vcombine.high %v90_v48, %v94_v47 }
  0x3c   :  { %2422 = vst [vmem:[#allocation24_spill] sm:$0xff] %v1671_v59  ;;  %2423 = vst [vmem:[#allocation25_spill] sm:$0xff] %v1674_v58 }
  0x3d   :  { %2421 = vst [vmem:[#allocation23_spill] sm:$0xff] %v1669_v1  ;;  %2428 = vst [vmem:[#allocation30_spill] sm:$0xff] %v1691_v4 }
  0x3e   :  { %832 = vmatpush2.bf16.msra.mxu0 %v1645_v22  ;;  %873 = vmatpush2.bf16.msra.mxu1 %v1649_v23  ;;  %v101_v22 = vld [vmem:[#allocation2 + $0x260] sm:$0xff]  ;;  %2430 = vst [vmem:[#allocation32_spill] sm:$0xff] %v1696_v40 }
  0x3f   :  { %833 = vmatprep.subr.bf16.mxu0 %v1651_v24  ;;  %874 = vmatprep.subr.bf16.mxu1 %v1654_v33  ;;  %v1680_v17 = vcombine.high %v97_v61, %v101_v22  ;;  %v1683_v33 = vcombine.high %v98_v2, %v102_v6  ;;  %v89_v24 = vld [vmem:[#allocation2 + $0x200] sm:$0xff]  ;;  %v1687_v38 = vcombine.low %v97_v61, %v101_v22 }
  0x40   :  { %v93_v23 = vld [vmem:[#allocation2 + $0x220] sm:$0xff]  ;;  %v1705_v22 = vcombine.low %v90_v48, %v94_v47 }
  0x41   :  { %2425 = vst [vmem:[#allocation27_spill] sm:$0xff] %v1680_v17  ;;  %2426 = vst [vmem:[#allocation28_spill] sm:$0xff] %v1683_v33  ;;  %v1693_v39 = vcombine.high %v89_v24, %v93_v23  ;;  %v1701_v61 = vcombine.low %v89_v24, %v93_v23  ;;  %v76_v23 = vld [vmem:[#allocation2 + $0x198] sm:$0xff] }
  0x42   :  { %834 = vmatpush2.bf16.msra.mxu0 %v1657_v49  ;;  %875 = vmatpush2.bf16.msra.mxu1 %v1664_v55  ;;  %v157_v49 = vunpack.c.l.bf16 %v1671_v59  ;;  %2427 = vst [vmem:[#allocation29_spill] sm:$0xff] %v1687_v38  ;;  %v84_v59 = vld [vmem:[#allocation2 + $0x1d8] sm:$0xff]  ;;  %2433 = vst [vmem:[#allocation35_spill] sm:$0xff] %v1705_v22 }
  0x43   :  { %835 = vmatprep.subr.bf16.mxu0 %v1666_v56  ;;  %876 = vmatprep.subr.bf16.mxu1 %v1669_v1  ;;  %2429 = vst [vmem:[#allocation31_spill] sm:$0xff] %v1693_v39  ;;  %v83_v1 = vld [vmem:[#allocation2 + $0x1d0] sm:$0xff]  ;;  %2432 = vst [vmem:[#allocation34_spill] sm:$0xff] %v1701_v61  ;;  %v80_v24 = vld [vmem:[#allocation2 + $0x1b8] sm:$0xff] }
  0x44   :  { %v87_v56 = vld [vmem:[#allocation2 + $0x1f0] sm:$0xff]  ;;  %v1698_v55 = vsub.f32 %v153_v53, %v157_v49 }
  0x45   :  { %v1707_v2 = vcombine.high %v83_v1, %v87_v56  ;;  %v75_v49 = vld [vmem:[#allocation2 + $0x190] sm:$0xff] }
  0x46   :  { %836 = vmatpush2.bf16.msra.mxu0 %v1674_v58  ;;  %877 = vmatpush2.bf16.msra.mxu1 %v1678_v7  ;;  %2431 = vst [vmem:[#allocation33_spill] sm:$0xff] %v1698_v55  ;;  %v88_v58 = vld [vmem:[#allocation2 + $0x1f8] sm:$0xff]  ;;  %v79_v53 = vld [vmem:[#allocation2 + $0x1b0] sm:$0xff] }
  0x47   :  { %837 = vmatprep.subr.bf16.mxu0 %v1680_v17  ;;  %878 = vmatprep.subr.bf16.mxu1 %v1683_v33  ;;  %2434 = vst [vmem:[#allocation36_spill] sm:$0xff] %v1707_v2  ;;  %v1710_v6 = vcombine.high %v84_v59, %v88_v58  ;;  %v1714_v33 = vpack.c.bf16 %v1698_v55, %v1698_v55  ;;  %v67_v55 = vld [vmem:[#allocation2 + $0x150] sm:$0xff] }
  0x48   :  { %v1721_v47 = vcombine.low %v84_v59, %v88_v58  ;;  %v1723_v48 = vcombine.high %v75_v49, %v79_v53  ;;  %v1735_v58 = vcombine.low %v76_v23, %v80_v24 }
  0x49   :  { %2435 = vst [vmem:[#allocation37_spill] sm:$0xff] %v1710_v6  ;;  %2436 = vst [vmem:[#allocation38_spill] sm:$0xff] %v1714_v33 }
  0x4a   :  { %838 = vmatpush2.bf16.msra.mxu0 %v1687_v38  ;;  %879 = vmatpush2.bf16.msra.mxu1 %v1691_v4  ;;  %v1717_v4 = vcombine.low %v83_v1, %v87_v56  ;;  %2438 = vst [vmem:[#allocation40_spill] sm:$0xff] %v1721_v47  ;;  %2439 = vst [vmem:[#allocation41_spill] sm:$0xff] %v1723_v48  ;;  %v68_v38 = vld [vmem:[#allocation2 + $0x158] sm:$0xff]  ;;  %v1731_v1 = vcombine.low %v75_v49, %v79_v53 }
  0x4b   :  { %839 = vmatprep.subr.bf16.mxu0 %v1693_v39  ;;  %880 = vmatprep.subr.bf16.mxu1 %v1696_v40  ;;  %v1726_v40 = vcombine.high %v76_v23, %v80_v24  ;;  %v71_v39 = vld [vmem:[#allocation2 + $0x170] sm:$0xff]  ;;  %2442 = vst [vmem:[#allocation44_spill] sm:$0xff] %v1735_v58 }
  0x4c   :  { %2437 = vst [vmem:[#allocation39_spill] sm:$0xff] %v1717_v4  ;;  %2441 = vst [vmem:[#allocation43_spill] sm:$0xff] %v1731_v1  ;;  %v1737_v59 = vcombine.high %v67_v55, %v71_v39  ;;  %v1745_v49 = vcombine.low %v67_v55, %v71_v39 }
  0x4d   :  { %2440 = vst [vmem:[#allocation42_spill] sm:$0xff] %v1726_v40 }
  0x4e   :  { %840 = vmatpush2.bf16.msra.mxu0 %v1701_v61  ;;  %881 = vmatpush2.bf16.msra.mxu1 %v1705_v22  ;;  %v72_v61 = vld [vmem:[#allocation2 + $0x178] sm:$0xff]  ;;  %2443 = vst [vmem:[#allocation45_spill] sm:$0xff] %v1737_v59  ;;  %2445 = vst [vmem:[#allocation47_spill] sm:$0xff] %v1745_v49 }
  0x4f   :  { %891 = vmatprep.subr.bf16.mxu0 %v1707_v2  ;;  %932 = vmatprep.subr.bf16.mxu1 %v1710_v6  ;;  %v1740_v56 = vcombine.high %v68_v38, %v72_v61  ;;  %v59_v6 = vld [vmem:[#allocation2 + $0x110] sm:$0xff]  ;;  %v60_v22 = vld [vmem:[#allocation2 + $0x118] sm:$0xff]  ;;  %v1749_v53 = vcombine.low %v68_v38, %v72_v61 }
  0x50   :  { %v63_v2 = vld [vmem:[#allocation2 + $0x130] sm:$0xff] }
  0x51   :  { %842 = vmatmul.mubr.bf16.vlgmr.msra.gmra.mxu0 %v1714_v33  ;;  %883 = vmatmul.mubr.bf16.vlgmr.msra.gmra.mxu1 %v1714_v33  ;;  %2444 = vst [vmem:[#allocation46_spill] sm:$0xff] %v1740_v56  ;;  %2446 = vst [vmem:[#allocation48_spill] sm:$0xff] %v1749_v53  ;;  %v1751_v23 = vcombine.high %v59_v6, %v63_v2  ;;  %v1757_v55 = vcombine.low %v59_v6, %v63_v2 }
  0x52   :  { %892 = vmatpush1.bf16.msra.mxu0 %v1717_v4  ;;  %933 = vmatpush1.bf16.msra.mxu1 %v1721_v47  ;;  %v64_v4 = vld [vmem:[#allocation2 + $0x138] sm:$0xff] }
  0x53   :  { %893 = vmatprep.subr.bf16.mxu0 %v1723_v48  ;;  %934 = vmatprep.subr.bf16.mxu1 %v1726_v40  ;;  %2447 = vst [vmem:[#allocation49_spill] sm:$0xff] %v1751_v23  ;;  %v1754_v24 = vcombine.high %v60_v22, %v64_v4  ;;  %v51_v40 = vld [vmem:[#allocation2 + $0xd0] sm:$0xff]  ;;  %v52_v47 = vld [vmem:[#allocation2 + $0xd8] sm:$0xff]  ;;  %2449 = vst [vmem:[#allocation51_spill] sm:$0xff] %v1757_v55  ;;  %v1761_v38 = vcombine.low %v60_v22, %v64_v4 }
  0x54   :  { %923 = vmatprep.mubr.bf16.mxu0 %v1595_v12  ;;  %964 = vmatprep.mubr.bf16.mxu1 %v1595_v12  ;;  %v55_v48 = vld [vmem:[#allocation2 + $0xf0] sm:$0xff]  ;;  %v56_v12 = vld [vmem:[#allocation2 + $0xf8] sm:$0xff] }
  0x55   :  { %2448 = vst [vmem:[#allocation50_spill] sm:$0xff] %v1754_v24  ;;  %2450 = vst [vmem:[#allocation52_spill] sm:$0xff] %v1761_v38  ;;  %v1763_v39 = vcombine.high %v51_v40, %v55_v48  ;;  %v1766_v61 = vcombine.high %v52_v47, %v56_v12  ;;  %v1769_v2 = vcombine.low %v51_v40, %v55_v48 }
  0x56   :  { %894 = vmatpush1.bf16.msra.mxu0 %v1731_v1  ;;  %935 = vmatpush1.bf16.msra.mxu1 %v1735_v58  ;;  %v44_v58 = vld [vmem:[#allocation2 + $0x98] sm:$0xff]  ;;  %v1773_v4 = vcombine.low %v52_v47, %v56_v12 }
  0x57   :  { %895 = vmatprep.subr.bf16.mxu0 %v1737_v59  ;;  %936 = vmatprep.subr.bf16.mxu1 %v1740_v56  ;;  %2451 = vst [vmem:[#allocation53_spill] sm:$0xff] %v1763_v39  ;;  %2452 = vst [vmem:[#allocation54_spill] sm:$0xff] %v1766_v61  ;;  %v43_v56 = vld [vmem:[#allocation2 + $0x90] sm:$0xff]  ;;  %v48_v1 = vld [vmem:[#allocation2 + $0xb8] sm:$0xff] }
  0x58   :  { %v47_v59 = vld [vmem:[#allocation2 + $0xb0] sm:$0xff]  ;;  %2453 = vst [vmem:[#allocation55_spill] sm:$0xff] %v1769_v2  ;;  %2454 = vst [vmem:[#allocation56_spill] sm:$0xff] %v1773_v4  ;;  %v1778_v6 = vcombine.high %v44_v58, %v48_v1  ;;  %v1785_v12 = vcombine.low %v44_v58, %v48_v1 }
  0x59   :  { %v1775_v22 = vcombine.high %v43_v56, %v47_v59  ;;  %v1781_v40 = vcombine.low %v43_v56, %v47_v59 }
  0x5a   :  { %896 = vmatpush1.bf16.msra.mxu0 %v1745_v49  ;;  %937 = vmatpush1.bf16.msra.mxu1 %v1749_v53  ;;  %2456 = vst [vmem:[#allocation58_spill] sm:$0xff] %v1778_v6  ;;  %v36_v53 = vld [vmem:[#allocation2 + $0x58] sm:$0xff]  ;;  %2458 = vst [vmem:[#allocation60_spill] sm:$0xff] %v1785_v12 }
  0x5b   :  { %897 = vmatprep.subr.bf16.mxu0 %v1751_v23  ;;  %938 = vmatprep.subr.bf16.mxu1 %v1754_v24  ;;  %2455 = vst [vmem:[#allocation57_spill] sm:$0xff] %v1775_v22  ;;  %v35_v24 = vld [vmem:[#allocation2 + $0x50] sm:$0xff]  ;;  %v40_v49 = vld [vmem:[#allocation2 + $0x78] sm:$0xff]  ;;  %2457 = vst [vmem:[#allocation59_spill] sm:$0xff] %v1781_v40 }
  0x5c   :  { %v39_v23 = vld [vmem:[#allocation2 + $0x70] sm:$0xff]  ;;  %v1790_v48 = vcombine.high %v36_v53, %v40_v49  ;;  %v1797_v1 = vcombine.low %v36_v53, %v40_v49 }
  0x5d   :  { %v1787_v47 = vcombine.high %v35_v24, %v39_v23  ;;  %v1793_v59 = vcombine.low %v35_v24, %v39_v23 }
  0x5e   :  { %898 = vmatpush1.bf16.msra.mxu0 %v1757_v55  ;;  %939 = vmatpush1.bf16.msra.mxu1 %v1761_v38  ;;  %2460 = vst [vmem:[#allocation62_spill] sm:$0xff] %v1790_v48  ;;  %v28_v38 = vld [vmem:[#allocation2 + $0x18] sm:$0xff]  ;;  %2462 = vst [vmem:[#allocation64_spill] sm:$0xff] %v1797_v1 }
  0x5f   :  { %899 = vmatprep.subr.bf16.mxu0 %v1763_v39  ;;  %940 = vmatprep.subr.bf16.mxu1 %v1766_v61  ;;  %2459 = vst [vmem:[#allocation61_spill] sm:$0xff] %v1787_v47  ;;  %v27_v61 = vld [vmem:[#allocation2 + $0x10] sm:$0xff]  ;;  %v32_v55 = vld [vmem:[#allocation2 + $0x38] sm:$0xff]  ;;  %2461 = vst [vmem:[#allocation63_spill] sm:$0xff] %v1793_v59 }
  0x60   :  { %v31_v39 = vld [vmem:[#allocation2 + $0x30] sm:$0xff]  ;;  %v1802_v56 = vcombine.high %v28_v38, %v32_v55  ;;  %v1809_v49 = vcombine.low %v28_v38, %v32_v55 }
  0x61   :  { %v1799_v58 = vcombine.high %v27_v61, %v31_v39  ;;  %v1805_v23 = vcombine.low %v27_v61, %v31_v39 }
  0x62   :  { %900 = vmatpush1.bf16.msra.mxu0 %v1769_v2  ;;  %941 = vmatpush1.bf16.msra.mxu1 %v1773_v4  ;;  %2464 = vst [vmem:[#allocation66_spill] sm:$0xff] %v1802_v56  ;;  %v148_v4 = vld [vmem:[#allocation2 + $0x3d8] sm:$0xff]  ;;  %2466 = vst [vmem:[#allocation68_spill] sm:$0xff] %v1809_v49 }
  0x63   :  { %901 = vmatprep.subr.bf16.mxu0 %v1775_v22  ;;  %942 = vmatprep.subr.bf16.mxu1 %v1778_v6  ;;  %2463 = vst [vmem:[#allocation65_spill] sm:$0xff] %v1799_v58  ;;  %v147_v6 = vld [vmem:[#allocation2 + $0x3d0] sm:$0xff]  ;;  %v152_v2 = vld [vmem:[#allocation2 + $0x3f8] sm:$0xff]  ;;  %2465 = vst [vmem:[#allocation67_spill] sm:$0xff] %v1805_v23 }
  0x64   :  { %v151_v22 = vld [vmem:[#allocation2 + $0x3f0] sm:$0xff]  ;;  %v1814_v24 = vcombine.high %v148_v4, %v152_v2  ;;  %v1821_v55 = vcombine.low %v148_v4, %v152_v2 }
  0x65   :  { %v1811_v53 = vcombine.high %v147_v6, %v151_v22  ;;  %v1817_v39 = vcombine.low %v147_v6, %v151_v22 }
  0x66   :  { %902 = vmatpush1.bf16.msra.mxu0 %v1781_v40  ;;  %943 = vmatpush1.bf16.msra.mxu1 %v1785_v12  ;;  %2468 = vst [vmem:[#allocation70_spill] sm:$0xff] %v1814_v24  ;;  %v140_v12 = vld [vmem:[#allocation2 + $0x398] sm:$0xff]  ;;  %2470 = vst [vmem:[#allocation72_spill] sm:$0xff] %v1821_v55 }
  0x67   :  { %903 = vmatprep.subr.bf16.mxu0 %v1787_v47  ;;  %944 = vmatprep.subr.bf16.mxu1 %v1790_v48  ;;  %2467 = vst [vmem:[#allocation69_spill] sm:$0xff] %v1811_v53  ;;  %v139_v48 = vld [vmem:[#allocation2 + $0x390] sm:$0xff]  ;;  %v144_v40 = vld [vmem:[#allocation2 + $0x3b8] sm:$0xff]  ;;  %2469 = vst [vmem:[#allocation71_spill] sm:$0xff] %v1817_v39 }
  0x68   :  { %v143_v47 = vld [vmem:[#allocation2 + $0x3b0] sm:$0xff]  ;;  %v1826_v61 = vcombine.high %v140_v12, %v144_v40  ;;  %v1833_v2 = vcombine.low %v140_v12, %v144_v40 }
  0x69   :  { %v1823_v38 = vcombine.high %v139_v48, %v143_v47  ;;  %v1829_v22 = vcombine.low %v139_v48, %v143_v47 }
  0x6a   :  { %904 = vmatpush1.bf16.msra.mxu0 %v1793_v59  ;;  %945 = vmatpush1.bf16.msra.mxu1 %v1797_v1  ;;  %2472 = vst [vmem:[#allocation74_spill] sm:$0xff] %v1826_v61  ;;  %v132_v1 = vld [vmem:[#allocation2 + $0x358] sm:$0xff]  ;;  %2474 = vst [vmem:[#allocation76_spill] sm:$0xff] %v1833_v2 }
  0x6b   :  { %905 = vmatprep.subr.bf16.mxu0 %v1799_v58  ;;  %946 = vmatprep.subr.bf16.mxu1 %v1802_v56  ;;  %2471 = vst [vmem:[#allocation73_spill] sm:$0xff] %v1823_v38  ;;  %v131_v56 = vld [vmem:[#allocation2 + $0x350] sm:$0xff]  ;;  %v136_v59 = vld [vmem:[#allocation2 + $0x378] sm:$0xff]  ;;  %2473 = vst [vmem:[#allocation75_spill] sm:$0xff] %v1829_v22 }
  0x6c   :  { %v135_v58 = vld [vmem:[#allocation2 + $0x370] sm:$0xff]  ;;  %v1838_v6 = vcombine.high %v132_v1, %v136_v59  ;;  %v1845_v40 = vcombine.low %v132_v1, %v136_v59 }
  0x6d   :  { %v1835_v4 = vcombine.high %v131_v56, %v135_v58  ;;  %v1841_v47 = vcombine.low %v131_v56, %v135_v58 }
  0x6e   :  { %906 = vmatpush1.bf16.msra.mxu0 %v1805_v23  ;;  %947 = vmatpush1.bf16.msra.mxu1 %v1809_v49  ;;  %2476 = vst [vmem:[#allocation78_spill] sm:$0xff] %v1838_v6  ;;  %v124_v49 = vld [vmem:[#allocation2 + $0x318] sm:$0xff]  ;;  %2478 = vst [vmem:[#allocation80_spill] sm:$0xff] %v1845_v40 }
  0x6f   :  { %907 = vmatprep.subr.bf16.mxu0 %v1811_v53  ;;  %948 = vmatprep.subr.bf16.mxu1 %v1814_v24  ;;  %2475 = vst [vmem:[#allocation77_spill] sm:$0xff] %v1835_v4  ;;  %v123_v24 = vld [vmem:[#allocation2 + $0x310] sm:$0xff]  ;;  %v128_v23 = vld [vmem:[#allocation2 + $0x338] sm:$0xff]  ;;  %2477 = vst [vmem:[#allocation79_spill] sm:$0xff] %v1841_v47 }
  0x70   :  { %v127_v53 = vld [vmem:[#allocation2 + $0x330] sm:$0xff]  ;;  %v1850_v48 = vcombine.high %v124_v49, %v128_v23  ;;  %v1857_v59 = vcombine.low %v124_v49, %v128_v23 }
  0x71   :  { %v1847_v12 = vcombine.high %v123_v24, %v127_v53  ;;  %v1853_v58 = vcombine.low %v123_v24, %v127_v53 }
  0x72   :  { %908 = vmatpush2.bf16.msra.mxu0 %v1817_v39  ;;  %949 = vmatpush2.bf16.msra.mxu1 %v1821_v55  ;;  %2480 = vst [vmem:[#allocation82_spill] sm:$0xff] %v1850_v48  ;;  %v116_v55 = vld [vmem:[#allocation2 + $0x2d8] sm:$0xff]  ;;  %2482 = vst [vmem:[#allocation84_spill] sm:$0xff] %v1857_v59 }
  0x73   :  { %909 = vmatprep.subr.bf16.mxu0 %v1823_v38  ;;  %950 = vmatprep.subr.bf16.mxu1 %v1826_v61  ;;  %2479 = vst [vmem:[#allocation81_spill] sm:$0xff] %v1847_v12  ;;  %v115_v61 = vld [vmem:[#allocation2 + $0x2d0] sm:$0xff]  ;;  %v120_v39 = vld [vmem:[#allocation2 + $0x2f8] sm:$0xff]  ;;  %2481 = vst [vmem:[#allocation83_spill] sm:$0xff] %v1853_v58 }
  0x74   :  { %v119_v38 = vld [vmem:[#allocation2 + $0x2f0] sm:$0xff]  ;;  %v1862_v56 = vcombine.high %v116_v55, %v120_v39  ;;  %v1869_v23 = vcombine.low %v116_v55, %v120_v39 }
  0x75   :  { %v1859_v1 = vcombine.high %v115_v61, %v119_v38  ;;  %v1865_v53 = vcombine.low %v115_v61, %v119_v38 }
  0x76   :  { %910 = vmatpush2.bf16.msra.mxu0 %v1829_v22  ;;  %951 = vmatpush2.bf16.msra.mxu1 %v1833_v2  ;;  %2484 = vst [vmem:[#allocation86_spill] sm:$0xff] %v1862_v56  ;;  %v108_v2 = vld [vmem:[#allocation2 + $0x298] sm:$0xff] }
  0x77   :  { %911 = vmatprep.subr.bf16.mxu0 %v1835_v4  ;;  %952 = vmatprep.subr.bf16.mxu1 %v1838_v6  ;;  %2483 = vst [vmem:[#allocation85_spill] sm:$0xff] %v1859_v1  ;;  %v107_v6 = vld [vmem:[#allocation2 + $0x290] sm:$0xff]  ;;  %v112_v22 = vld [vmem:[#allocation2 + $0x2b8] sm:$0xff] }
  0x78   :  { %v111_v4 = vld [vmem:[#allocation2 + $0x2b0] sm:$0xff]  ;;  %v1874_v24 = vcombine.high %v108_v2, %v112_v22  ;;  %v1881_v39 = vcombine.low %v108_v2, %v112_v22 }
  0x79   :  { %v1871_v49 = vcombine.high %v107_v6, %v111_v4  ;;  %v1877_v38 = vcombine.low %v107_v6, %v111_v4 }
  0x7a   :  { %912 = vmatpush2.bf16.msra.mxu0 %v1841_v47  ;;  %953 = vmatpush2.bf16.msra.mxu1 %v1845_v40  ;;  %2486 = vst [vmem:[#allocation88_spill] sm:$0xff] %v1874_v24  ;;  %v100_v40 = vld [vmem:[#allocation2 + $0x258] sm:$0xff] }
  0x7b   :  { %913 = vmatprep.subr.bf16.mxu0 %v1847_v12  ;;  %954 = vmatprep.subr.bf16.mxu1 %v1850_v48  ;;  %2485 = vst [vmem:[#allocation87_spill] sm:$0xff] %v1871_v49  ;;  %v99_v48 = vld [vmem:[#allocation2 + $0x250] sm:$0xff]  ;;  %v104_v47 = vld [vmem:[#allocation2 + $0x278] sm:$0xff] }
  0x7c   :  { %v103_v12 = vld [vmem:[#allocation2 + $0x270] sm:$0xff]  ;;  %v1886_v61 = vcombine.high %v100_v40, %v104_v47  ;;  %v1893_v22 = vcombine.low %v100_v40, %v104_v47  ;;  %v2489_v47 = vld [vmem:[#allocation10_spill] sm:$0xff] }
  0x7d   :  { %v1883_v55 = vcombine.high %v99_v48, %v103_v12  ;;  %v1889_v4 = vcombine.low %v99_v48, %v103_v12  ;;  %v2490_v40 = vld [vmem:[#allocation11_spill] sm:$0xff]  ;;  %v2491_v48 = vld [vmem:[#allocation12_spill] sm:$0xff] }
  0x7e   :  { %914 = vmatpush2.bf16.msra.mxu0 %v1853_v58  ;;  %955 = vmatpush2.bf16.msra.mxu1 %v1857_v59  ;;  %2487 = vst [vmem:[#allocation89_spill] sm:$0xff] %v1886_v61  ;;  %v92_v59 = vld [vmem:[#allocation2 + $0x218] sm:$0xff]  ;;  %2488 = vst [vmem:[#allocation90_spill] sm:$0xff] %v1893_v22 }
  0x7f   :  { %915 = vmatprep.subr.bf16.mxu0 %v1859_v1  ;;  %956 = vmatprep.subr.bf16.mxu1 %v1862_v56  ;;  %v91_v56 = vld [vmem:[#allocation2 + $0x210] sm:$0xff]  ;;  %v96_v58 = vld [vmem:[#allocation2 + $0x238] sm:$0xff] }
  0x80   :  { %v95_v1 = vld [vmem:[#allocation2 + $0x230] sm:$0xff]  ;;  %v1898_v6 = vcombine.high %v92_v59, %v96_v58  ;;  %v1905_v12 = vcombine.low %v92_v59, %v96_v58  ;;  %v2492_v58 = vld [vmem:[#allocation13_spill] sm:$0xff]  ;;  %v2493_v59 = vld [vmem:[#allocation14_spill] sm:$0xff] }
  0x81   :  { %v1895_v2 = vcombine.high %v91_v56, %v95_v1 }
  0x82   :  { %916 = vmatpush2.bf16.msra.mxu0 %v1865_v53  ;;  %957 = vmatpush2.bf16.msra.mxu1 %v1869_v23 }
  0x83   :  { %917 = vmatprep.subr.bf16.mxu0 %v1871_v49  ;;  %958 = vmatprep.subr.bf16.mxu1 %v1874_v24  ;;  %v1901_v24 = vcombine.low %v91_v56, %v95_v1  ;;  %v2494_v1 = vld [vmem:[#allocation15_spill] sm:$0xff]  ;;  %v2495_v56 = vld [vmem:[#allocation16_spill] sm:$0xff] }
  0x86   :  { %918 = vmatpush2.bf16.msra.mxu0 %v1877_v38  ;;  %959 = vmatpush2.bf16.msra.mxu1 %v1881_v39 }
  0x87   :  { %919 = vmatprep.subr.bf16.mxu0 %v1883_v55  ;;  %960 = vmatprep.subr.bf16.mxu1 %v1886_v61 }
  0x8a   :  { %920 = vmatpush2.bf16.msra.mxu0 %v1889_v4  ;;  %961 = vmatpush2.bf16.msra.mxu1 %v1893_v22 }
  0x8b   :  { %921 = vmatprep.subr.bf16.mxu0 %v1895_v2  ;;  %962 = vmatprep.subr.bf16.mxu1 %v1898_v6 }
  0x8e   :  { %922 = vmatpush2.bf16.msra.mxu0 %v1901_v24  ;;  %963 = vmatpush2.bf16.msra.mxu1 %v1905_v12 }
  0x8f   :  { %973 = vmatprep.subr.bf16.mxu0 %v1496_v3  ;;  %1014 = vmatprep.subr.bf16.mxu1 %v1500_v8 }
  0x91   :  { %924 = vmatmul.mubr.bf16.vlgmr.msra.gmra.mxu0 %v1714_v33  ;;  %965 = vmatmul.mubr.bf16.vlgmr.msra.gmra.mxu1 %v1714_v33  ;;  %v2496_v33 = vld [vmem:[#allocation17_spill] sm:$0xff] }
  0x92   :  { %974 = vmatpush1.bf16.msra.mxu0 %v1498_v5  ;;  %1015 = vmatpush1.bf16.msra.mxu1 %v1502_v9 }
  0x93   :  { %975 = vmatprep.subr.bf16.mxu0 %v1504_v10  ;;  %1016 = vmatprep.subr.bf16.mxu1 %v1507_v14 }
  0x94   :  { %1005 = vmatprep.mubr.bf16.mxu0 %v1573_v57  ;;  %1046 = vmatprep.mubr.bf16.mxu1 %v1573_v57 }
  0x96   :  { %976 = vmatpush1.bf16.msra.mxu0 %v1511_v18  ;;  %1017 = vmatpush1.bf16.msra.mxu1 %v1515_v19 }
  0x97   :  { %977 = vmatprep.subr.bf16.mxu0 %v1517_v20  ;;  %1018 = vmatprep.subr.bf16.mxu1 %v1520_v21 }
  0x9a   :  { %978 = vmatpush1.bf16.msra.mxu0 %v1523_v26  ;;  %1019 = vmatpush1.bf16.msra.mxu1 %v1527_v27 }
  0x9b   :  { %979 = vmatprep.subr.bf16.mxu0 %v1529_v28  ;;  %1020 = vmatprep.subr.bf16.mxu1 %v1532_v29 }
  0x9e   :  { %980 = vmatpush1.bf16.msra.mxu0 %v1535_v34  ;;  %1021 = vmatpush1.bf16.msra.mxu1 %v1539_v35 }
  0x9f   :  { %981 = vmatprep.subr.bf16.mxu0 %v1541_v36  ;;  %1022 = vmatprep.subr.bf16.mxu1 %v1544_v37 }
  0xa2   :  { %982 = vmatpush1.bf16.msra.mxu0 %v1547_v42  ;;  %1023 = vmatpush1.bf16.msra.mxu1 %v1551_v43 }
  0xa3   :  { %983 = vmatprep.subr.bf16.mxu0 %v1553_v44  ;;  %1024 = vmatprep.subr.bf16.mxu1 %v1556_v45 }
  0xa6   :  { %984 = vmatpush1.bf16.msra.mxu0 %v1559_v50  ;;  %1025 = vmatpush1.bf16.msra.mxu1 %v1563_v51 }
  0xa7   :  { %985 = vmatprep.subr.bf16.mxu0 %v1565_v52  ;;  %1026 = vmatprep.subr.bf16.mxu1 %v1571_v54 }
  0xaa   :  { %986 = vmatpush1.bf16.msra.mxu0 %v1576_v60  ;;  %1027 = vmatpush1.bf16.msra.mxu1 %v1581_v62 }
  0xab   :  { %987 = vmatprep.subr.bf16.mxu0 %v1583_v63  ;;  %1028 = vmatprep.subr.bf16.mxu1 %v1586_v0 }
  0xae   :  { %988 = vmatpush1.bf16.msra.mxu0 %v1591_v11  ;;  %1029 = vmatpush1.bf16.msra.mxu1 %v1599_v13 }
  0xaf   :  { %989 = vmatprep.subr.bf16.mxu0 %v1601_v15  ;;  %1030 = vmatprep.subr.bf16.mxu1 %v1604_v16 }
  0xb2   :  { %990 = vmatpush2.bf16.msra.mxu0 %v1609_v25  ;;  %1031 = vmatpush2.bf16.msra.mxu1 %v1613_v30 }
  0xb3   :  { %991 = vmatprep.subr.bf16.mxu0 %v1615_v31  ;;  %1032 = vmatprep.subr.bf16.mxu1 %v1618_v32  ;;  %v2497_v32 = vld [vmem:[#allocation18_spill] sm:$0xff] }
  0xb6   :  { %992 = vmatpush2.bf16.msra.mxu0 %v1621_v41  ;;  %1033 = vmatpush2.bf16.msra.mxu1 %v1625_v46  ;;  %v2498_v41 = vld [vmem:[#allocation19_spill] sm:$0xff]  ;;  %v2499_v46 = vld [vmem:[#allocation20_spill] sm:$0xff] }
  0xb7   :  { %993 = vmatprep.subr.bf16.mxu0 %v2489_v47  ;;  %1034 = vmatprep.subr.bf16.mxu1 %v2490_v40  ;;  %v2500_v47 = vld [vmem:[#allocation21_spill] sm:$0xff]  ;;  %v2501_v40 = vld [vmem:[#allocation22_spill] sm:$0xff] }
  0xba   :  { %994 = vmatpush2.bf16.msra.mxu0 %v2491_v48  ;;  %1035 = vmatpush2.bf16.msra.mxu1 %v2492_v58  ;;  %v2502_v48 = vld [vmem:[#allocation23_spill] sm:$0xff]  ;;  %v2503_v58 = vld [vmem:[#allocation25_spill] sm:$0xff] }
  0xbb   :  { %995 = vmatprep.subr.bf16.mxu0 %v2493_v59  ;;  %1036 = vmatprep.subr.bf16.mxu1 %v2494_v1 }
  0xbe   :  { %996 = vmatpush2.bf16.msra.mxu0 %v2495_v56  ;;  %1037 = vmatpush2.bf16.msra.mxu1 %v2496_v33  ;;  %v2504_v56 = vld [vmem:[#allocation28_spill] sm:$0xff]  ;;  %v2505_v33 = vld [vmem:[#allocation29_spill] sm:$0xff] }
  0xbf   :  { %997 = vmatprep.subr.bf16.mxu0 %v2497_v32  ;;  %1038 = vmatprep.subr.bf16.mxu1 %v2498_v41  ;;  %v2506_v32 = vld [vmem:[#allocation30_spill] sm:$0xff]  ;;  %v2507_v41 = vld [vmem:[#allocation31_spill] sm:$0xff] }
  0xc2   :  { %998 = vmatpush2.bf16.msra.mxu0 %v2499_v46  ;;  %1039 = vmatpush2.bf16.msra.mxu1 %v2500_v47  ;;  %v2508_v46 = vld [vmem:[#allocation32_spill] sm:$0xff]  ;;  %v2509_v47 = vld [vmem:[#allocation34_spill] sm:$0xff] }
  0xc3   :  { %999 = vmatprep.subr.bf16.mxu0 %v2501_v40  ;;  %1040 = vmatprep.subr.bf16.mxu1 %v2502_v48  ;;  %v2510_v40 = vld [vmem:[#allocation35_spill] sm:$0xff]  ;;  %v2511_v48 = vld [vmem:[#allocation36_spill] sm:$0xff] }
  0xc6   :  { %1000 = vmatpush2.bf16.msra.mxu0 %v2503_v58  ;;  %1041 = vmatpush2.bf16.msra.mxu1 %v1678_v7  ;;  %v2512_v58 = vld [vmem:[#allocation37_spill] sm:$0xff]  ;;  %v2513_v7 = vld [vmem:[#allocation24_spill] sm:$0xff] }
  0xc7   :  { %1001 = vmatprep.subr.bf16.mxu0 %v1680_v17  ;;  %1042 = vmatprep.subr.bf16.mxu1 %v2504_v56  ;;  %v2514_v56 = vld [vmem:[#allocation39_spill] sm:$0xff]  ;;  %v2527_v17 = vld [vmem:[#allocation52_spill] sm:$0xff] }
  0xca   :  { %1002 = vmatpush2.bf16.msra.mxu0 %v2505_v33  ;;  %1043 = vmatpush2.bf16.msra.mxu1 %v2506_v32  ;;  %v2515_v33 = vld [vmem:[#allocation40_spill] sm:$0xff]  ;;  %v2516_v32 = vld [vmem:[#allocation41_spill] sm:$0xff] }
  0xcb   :  { %1003 = vmatprep.subr.bf16.mxu0 %v2507_v41  ;;  %1044 = vmatprep.subr.bf16.mxu1 %v2508_v46  ;;  %v2517_v41 = vld [vmem:[#allocation42_spill] sm:$0xff]  ;;  %v2522_v46 = vld [vmem:[#allocation47_spill] sm:$0xff] }
  0xce   :  { %1004 = vmatpush2.bf16.msra.mxu0 %v2509_v47  ;;  %1045 = vmatpush2.bf16.msra.mxu1 %v2510_v40  ;;  %v2518_v40 = vld [vmem:[#allocation43_spill] sm:$0xff]  ;;  %v2521_v47 = vld [vmem:[#allocation46_spill] sm:$0xff] }
  0xcf   :  { %1055 = vmatprep.subr.bf16.mxu0 %v2511_v48  ;;  %1096 = vmatprep.subr.bf16.mxu1 %v2512_v58  ;;  %v2519_v48 = vld [vmem:[#allocation44_spill] sm:$0xff]  ;;  %v2520_v58 = vld [vmem:[#allocation45_spill] sm:$0xff] }
  0xd1   :  { %1006 = vmatmul.mubr.bf16.vlgmr.msra.gmra.mxu0 %v2513_v7  ;;  %1047 = vmatmul.mubr.bf16.vlgmr.msra.gmra.mxu1 %v2513_v7 }
  0xd2   :  { %1056 = vmatpush1.bf16.msra.mxu0 %v2514_v56  ;;  %1097 = vmatpush1.bf16.msra.mxu1 %v2515_v33  ;;  %v2523_v56 = vld [vmem:[#allocation48_spill] sm:$0xff]  ;;  %v2524_v33 = vld [vmem:[#allocation49_spill] sm:$0xff] }
  0xd3   :  { %1057 = vmatprep.subr.bf16.mxu0 %v2516_v32  ;;  %1098 = vmatprep.subr.bf16.mxu1 %v2517_v41  ;;  %v2525_v32 = vld [vmem:[#allocation50_spill] sm:$0xff]  ;;  %v2526_v41 = vld [vmem:[#allocation51_spill] sm:$0xff] }
  0xd4   :  { %1087 = vmatprep.mubr.bf16.mxu0 %v1573_v57  ;;  %1128 = vmatprep.mubr.bf16.mxu1 %v1573_v57  ;;  %v2528_v57 = vld [vmem:[#allocation53_spill] sm:$0xff] }
  0xd6   :  { %1058 = vmatpush1.bf16.msra.mxu0 %v2518_v40  ;;  %1099 = vmatpush1.bf16.msra.mxu1 %v2519_v48  ;;  %v2529_v40 = vld [vmem:[#allocation54_spill] sm:$0xff]  ;;  %v2530_v48 = vld [vmem:[#allocation55_spill] sm:$0xff] }
  0xd7   :  { %1059 = vmatprep.subr.bf16.mxu0 %v2520_v58  ;;  %1100 = vmatprep.subr.bf16.mxu1 %v2521_v47  ;;  %v2531_v58 = vld [vmem:[#allocation56_spill] sm:$0xff]  ;;  %v2532_v47 = vld [vmem:[#allocation57_spill] sm:$0xff] }
  0xda   :  { %1060 = vmatpush1.bf16.msra.mxu0 %v2522_v46  ;;  %1101 = vmatpush1.bf16.msra.mxu1 %v2523_v56  ;;  %v2533_v46 = vld [vmem:[#allocation58_spill] sm:$0xff]  ;;  %v2534_v56 = vld [vmem:[#allocation59_spill] sm:$0xff] }
  0xdb   :  { %1061 = vmatprep.subr.bf16.mxu0 %v2524_v33  ;;  %1102 = vmatprep.subr.bf16.mxu1 %v2525_v32  ;;  %v2535_v33 = vld [vmem:[#allocation60_spill] sm:$0xff]  ;;  %v2536_v32 = vld [vmem:[#allocation61_spill] sm:$0xff] }
  0xde   :  { %1062 = vmatpush1.bf16.msra.mxu0 %v2526_v41  ;;  %1103 = vmatpush1.bf16.msra.mxu1 %v2527_v17  ;;  %v2537_v41 = vld [vmem:[#allocation62_spill] sm:$0xff]  ;;  %v2538_v17 = vld [vmem:[#allocation63_spill] sm:$0xff] }
  0xdf   :  { %1063 = vmatprep.subr.bf16.mxu0 %v2528_v57  ;;  %1104 = vmatprep.subr.bf16.mxu1 %v2529_v40  ;;  %v2539_v57 = vld [vmem:[#allocation64_spill] sm:$0xff]  ;;  %v2540_v40 = vld [vmem:[#allocation65_spill] sm:$0xff] }
  0xe2   :  { %1064 = vmatpush1.bf16.msra.mxu0 %v2530_v48  ;;  %1105 = vmatpush1.bf16.msra.mxu1 %v2531_v58  ;;  %v2541_v48 = vld [vmem:[#allocation66_spill] sm:$0xff]  ;;  %v2542_v58 = vld [vmem:[#allocation67_spill] sm:$0xff] }
  0xe3   :  { %1065 = vmatprep.subr.bf16.mxu0 %v2532_v47  ;;  %1106 = vmatprep.subr.bf16.mxu1 %v2533_v46  ;;  %v2543_v47 = vld [vmem:[#allocation68_spill] sm:$0xff]  ;;  %v2544_v46 = vld [vmem:[#allocation69_spill] sm:$0xff] }
  0xe6   :  { %1066 = vmatpush1.bf16.msra.mxu0 %v2534_v56  ;;  %1107 = vmatpush1.bf16.msra.mxu1 %v2535_v33  ;;  %v2545_v56 = vld [vmem:[#allocation70_spill] sm:$0xff]  ;;  %v2546_v33 = vld [vmem:[#allocation71_spill] sm:$0xff] }
  0xe7   :  { %1067 = vmatprep.subr.bf16.mxu0 %v2536_v32  ;;  %1108 = vmatprep.subr.bf16.mxu1 %v2537_v41  ;;  %v2547_v32 = vld [vmem:[#allocation72_spill] sm:$0xff]  ;;  %v2548_v41 = vld [vmem:[#allocation73_spill] sm:$0xff] }
  0xea   :  { %1068 = vmatpush1.bf16.msra.mxu0 %v2538_v17  ;;  %1109 = vmatpush1.bf16.msra.mxu1 %v2539_v57  ;;  %v2549_v17 = vld [vmem:[#allocation74_spill] sm:$0xff]  ;;  %v2550_v57 = vld [vmem:[#allocation75_spill] sm:$0xff] }
  0xeb   :  { %1069 = vmatprep.subr.bf16.mxu0 %v2540_v40  ;;  %1110 = vmatprep.subr.bf16.mxu1 %v2541_v48  ;;  %v2551_v40 = vld [vmem:[#allocation76_spill] sm:$0xff]  ;;  %v2552_v48 = vld [vmem:[#allocation77_spill] sm:$0xff] }
  0xee   :  { %1070 = vmatpush1.bf16.msra.mxu0 %v2542_v58  ;;  %1111 = vmatpush1.bf16.msra.mxu1 %v2543_v47  ;;  %v2553_v58 = vld [vmem:[#allocation78_spill] sm:$0xff]  ;;  %v2554_v47 = vld [vmem:[#allocation79_spill] sm:$0xff] }
  0xef   :  { %1071 = vmatprep.subr.bf16.mxu0 %v2544_v46  ;;  %1112 = vmatprep.subr.bf16.mxu1 %v2545_v56  ;;  %v2555_v46 = vld [vmem:[#allocation80_spill] sm:$0xff]  ;;  %v2556_v56 = vld [vmem:[#allocation81_spill] sm:$0xff] }
  0xf2   :  { %1072 = vmatpush2.bf16.msra.mxu0 %v2546_v33  ;;  %1113 = vmatpush2.bf16.msra.mxu1 %v2547_v32  ;;  %v2557_v33 = vld [vmem:[#allocation82_spill] sm:$0xff]  ;;  %v2558_v32 = vld [vmem:[#allocation83_spill] sm:$0xff] }
  0xf3   :  { %1073 = vmatprep.subr.bf16.mxu0 %v2548_v41  ;;  %1114 = vmatprep.subr.bf16.mxu1 %v2549_v17  ;;  %v2559_v41 = vld [vmem:[#allocation84_spill] sm:$0xff]  ;;  %v2560_v17 = vld [vmem:[#allocation85_spill] sm:$0xff] }
  0xf6   :  { %1074 = vmatpush2.bf16.msra.mxu0 %v2550_v57  ;;  %1115 = vmatpush2.bf16.msra.mxu1 %v2551_v40  ;;  %v2561_v57 = vld [vmem:[#allocation86_spill] sm:$0xff] }
  0xf7   :  { %1075 = vmatprep.subr.bf16.mxu0 %v2552_v48  ;;  %1116 = vmatprep.subr.bf16.mxu1 %v2553_v58 }
  0xfa   :  { %1076 = vmatpush2.bf16.msra.mxu0 %v2554_v47  ;;  %1117 = vmatpush2.bf16.msra.mxu1 %v2555_v46  ;;  %v2562_v47 = vld [vmem:[#allocation88_spill] sm:$0xff] }
  0xfb   :  { %1077 = vmatprep.subr.bf16.mxu0 %v2556_v56  ;;  %1118 = vmatprep.subr.bf16.mxu1 %v2557_v33 }
  0xfe   :  { %1078 = vmatpush2.bf16.msra.mxu0 %v2558_v32  ;;  %1119 = vmatpush2.bf16.msra.mxu1 %v2559_v41  ;;  %v2563_v41 = vld [vmem:[#allocation6_spill] sm:$0xff] }
  0xff   :  { %1079 = vmatprep.subr.bf16.mxu0 %v2560_v17  ;;  %1120 = vmatprep.subr.bf16.mxu1 %v2561_v57  ;;  %v164_v17 = vunpack.c.l.bf16 %v2563_v41 }
 0x102   :  { %1080 = vmatpush2.bf16.msra.mxu0 %v1865_v53  ;;  %1121 = vmatpush2.bf16.msra.mxu1 %v1869_v23 }
 0x103   :  { %1081 = vmatprep.subr.bf16.mxu0 %v1871_v49  ;;  %1122 = vmatprep.subr.bf16.mxu1 %v2562_v47  ;;  %v2564_v49 = vld [vmem:[#allocation5_spill] sm:$0xff] }
 0x104   :  { %v166_v47 = vsub.f32 %v2564_v49, %v164_v17 }
 0x106   :  { %1082 = vmatpush2.bf16.msra.mxu0 %v1877_v38  ;;  %1123 = vmatpush2.bf16.msra.mxu1 %v1881_v39 }
 0x107   :  { %1083 = vmatprep.subr.bf16.mxu0 %v1883_v55  ;;  %1124 = vmatprep.subr.bf16.mxu1 %v1886_v61  ;;  %v2050_v61 = vpack.c.bf16 %v166_v47, %v166_v47  ;;  %v2594_v47 = vld [vmem:[#allocation39_spill] sm:$0xff] }
 0x10a   :  { %1084 = vmatpush2.bf16.msra.mxu0 %v1889_v4  ;;  %1125 = vmatpush2.bf16.msra.mxu1 %v1893_v22 }
 0x10b   :  { %1085 = vmatprep.subr.bf16.mxu0 %v1895_v2  ;;  %1126 = vmatprep.subr.bf16.mxu1 %v1898_v6 }
 0x10e   :  { %1086 = vmatpush2.bf16.msra.mxu0 %v1901_v24  ;;  %1127 = vmatpush2.bf16.msra.mxu1 %v1905_v12 }
 0x10f   :  { %1137 = vmatprep.subr.bf16.mxu0 %v1496_v3  ;;  %1178 = vmatprep.subr.bf16.mxu1 %v1500_v8 }
 0x111   :  { %v2052_v41 = vpop.f32.mrf.mxu0  ;;  %1088 = vmatmul.mubr.bf16.vlgmr.msra.gmra.mxu0 %v2513_v7  ;;  %v2055_v22 = vpop.f32.mrf.mxu1  ;;  %1129 = vmatmul.mubr.bf16.vlgmr.msra.gmra.mxu1 %v2513_v7 }
 0x112   :  { %1138 = vmatpush1.bf16.msra.mxu0 %v1498_v5  ;;  %1179 = vmatpush1.bf16.msra.mxu1 %v1502_v9 }
 0x113   :  { %v2060_v17 = vpop.f32.mrf.mxu0  ;;  %1139 = vmatprep.subr.bf16.mxu0 %v1504_v10  ;;  %v2063_v3 = vpop.f32.mrf.mxu1  ;;  %1180 = vmatprep.subr.bf16.mxu1 %v1507_v14  ;;  %v2565_v10 = vld [vmem:[#allocation7_spill] sm:$0xff]  ;;  %v2566_v14 = vld [vmem:[#allocation8_spill] sm:$0xff] }
 0x114   :  { %1169 = vmatprep.mubr.bf16.mxu0 %v2050_v61  ;;  %1210 = vmatprep.mubr.bf16.mxu1 %v2050_v61 }
 0x115   :  { %v847_v8 = vpop.f32.mrf.mxu0  ;;  %v888_v49 = vpop.f32.mrf.mxu1 }
 0x116   :  { %1140 = vmatpush1.bf16.msra.mxu0 %v1511_v18  ;;  %1181 = vmatpush1.bf16.msra.mxu1 %v1515_v19  ;;  %v2567_v18 = vld [vmem:[#allocation9_spill] sm:$0xff]  ;;  %v2568_v19 = vld [vmem:[#allocation10_spill] sm:$0xff] }
 0x117   :  { %v848_v5 = vpop.f32.mrf.mxu0  ;;  %1141 = vmatprep.subr.bf16.mxu0 %v1517_v20  ;;  %v889_v9 = vpop.f32.mrf.mxu1  ;;  %1182 = vmatprep.subr.bf16.mxu1 %v1520_v21  ;;  %v2569_v20 = vld [vmem:[#allocation11_spill] sm:$0xff]  ;;  %v2570_v21 = vld [vmem:[#allocation12_spill] sm:$0xff]  ;;  %v2596_v8 = vld [vmem:[#allocation41_spill] sm:$0xff] }
 0x118   :  { %v2597_v5 = vld [vmem:[#allocation42_spill] sm:$0xff] }
 0x11a   :  { %1142 = vmatpush1.bf16.msra.mxu0 %v1523_v26  ;;  %1183 = vmatpush1.bf16.msra.mxu1 %v1527_v27  ;;  %v2571_v26 = vld [vmem:[#allocation13_spill] sm:$0xff]  ;;  %v2572_v27 = vld [vmem:[#allocation16_spill] sm:$0xff] }
 0x11b   :  { %1143 = vmatprep.subr.bf16.mxu0 %v1529_v28  ;;  %1184 = vmatprep.subr.bf16.mxu1 %v1532_v29  ;;  %v2573_v28 = vld [vmem:[#allocation17_spill] sm:$0xff]  ;;  %v2574_v29 = vld [vmem:[#allocation18_spill] sm:$0xff] }
 0x11e   :  { %1144 = vmatpush1.bf16.msra.mxu0 %v1535_v34  ;;  %1185 = vmatpush1.bf16.msra.mxu1 %v1539_v35  ;;  %v2575_v34 = vld [vmem:[#allocation19_spill] sm:$0xff]  ;;  %v2576_v35 = vld [vmem:[#allocation20_spill] sm:$0xff] }
 0x11f   :  { %1145 = vmatprep.subr.bf16.mxu0 %v1541_v36  ;;  %1186 = vmatprep.subr.bf16.mxu1 %v1544_v37  ;;  %v2577_v36 = vld [vmem:[#allocation21_spill] sm:$0xff]  ;;  %v2578_v37 = vld [vmem:[#allocation22_spill] sm:$0xff] }
 0x122   :  { %1146 = vmatpush1.bf16.msra.mxu0 %v1547_v42  ;;  %1187 = vmatpush1.bf16.msra.mxu1 %v1551_v43  ;;  %v2579_v42 = vld [vmem:[#allocation23_spill] sm:$0xff]  ;;  %v2580_v43 = vld [vmem:[#allocation38_spill] sm:$0xff] }
 0x123   :  { %1147 = vmatprep.subr.bf16.mxu0 %v1553_v44  ;;  %1188 = vmatprep.subr.bf16.mxu1 %v1556_v45  ;;  %v163_v44 = vunpack.c.l.bf16 %v2580_v43  ;;  %v2581_v45 = vld [vmem:[#allocation25_spill] sm:$0xff]  ;;  %v2611_v43 = vld [vmem:[#allocation56_spill] sm:$0xff] }
 0x126   :  { %1148 = vmatpush1.bf16.msra.mxu0 %v1559_v50  ;;  %1189 = vmatpush1.bf16.msra.mxu1 %v1563_v51  ;;  %v2582_v50 = vld [vmem:[#allocation26_spill] sm:$0xff]  ;;  %v2583_v51 = vld [vmem:[#allocation27_spill] sm:$0xff] }
 0x127   :  { %1149 = vmatprep.subr.bf16.mxu0 %v1565_v52  ;;  %1190 = vmatprep.subr.bf16.mxu1 %v1571_v54  ;;  %v2584_v52 = vld [vmem:[#allocation28_spill] sm:$0xff]  ;;  %v2585_v54 = vld [vmem:[#allocation33_spill] sm:$0xff] }
 0x12a   :  { %1150 = vmatpush1.bf16.msra.mxu0 %v1576_v60  ;;  %1191 = vmatpush1.bf16.msra.mxu1 %v1581_v62  ;;  %v165_v60 = vsub.f32 %v2585_v54, %v163_v44  ;;  %v2586_v62 = vld [vmem:[#allocation29_spill] sm:$0xff]  ;;  %v2617_v54 = vld [vmem:[#allocation62_spill] sm:$0xff] }
 0x12b   :  { %1151 = vmatprep.subr.bf16.mxu0 %v1583_v63  ;;  %1192 = vmatprep.subr.bf16.mxu1 %v1586_v0  ;;  %v2587_v63 = vld [vmem:[#allocation30_spill] sm:$0xff]  ;;  %v2588_v0 = vld [vmem:[#allocation31_spill] sm:$0xff]  ;;  %v2612_v44 = vld [vmem:[#allocation57_spill] sm:$0xff] }
 0x12e   :  { %1152 = vmatpush1.bf16.msra.mxu0 %v1591_v11  ;;  %1193 = vmatpush1.bf16.msra.mxu1 %v1599_v13  ;;  %v2589_v11 = vld [vmem:[#allocation32_spill] sm:$0xff]  ;;  %v2126_v13 = vpack.c.bf16 %v165_v60, %v165_v60  ;;  %v2618_v60 = vld [vmem:[#allocation63_spill] sm:$0xff] }
 0x12f   :  { %1153 = vmatprep.subr.bf16.mxu0 %v1601_v15  ;;  %1194 = vmatprep.subr.bf16.mxu1 %v1604_v16  ;;  %v2590_v15 = vld [vmem:[#allocation34_spill] sm:$0xff]  ;;  %v2591_v16 = vld [vmem:[#allocation35_spill] sm:$0xff] }
 0x132   :  { %1154 = vmatpush2.bf16.msra.mxu0 %v1609_v25  ;;  %1195 = vmatpush2.bf16.msra.mxu1 %v1613_v30  ;;  %v2592_v25 = vld [vmem:[#allocation36_spill] sm:$0xff]  ;;  %v2593_v30 = vld [vmem:[#allocation37_spill] sm:$0xff] }
 0x133   :  { %1155 = vmatprep.subr.bf16.mxu0 %v1615_v31  ;;  %1196 = vmatprep.subr.bf16.mxu1 %v2565_v10 }
 0x136   :  { %1156 = vmatpush2.bf16.msra.mxu0 %v2566_v14  ;;  %1197 = vmatpush2.bf16.msra.mxu1 %v2567_v18  ;;  %v2598_v14 = vld [vmem:[#allocation43_spill] sm:$0xff]  ;;  %v2599_v18 = vld [vmem:[#allocation44_spill] sm:$0xff] }
 0x137   :  { %1157 = vmatprep.subr.bf16.mxu0 %v2568_v19  ;;  %1198 = vmatprep.subr.bf16.mxu1 %v2569_v20  ;;  %v2600_v20 = vld [vmem:[#allocation45_spill] sm:$0xff] }
 0x13a   :  { %1158 = vmatpush2.bf16.msra.mxu0 %v2570_v21  ;;  %1199 = vmatpush2.bf16.msra.mxu1 %v2571_v26  ;;  %v2601_v26 = vld [vmem:[#allocation46_spill] sm:$0xff] }
 0x13b   :  { %1159 = vmatprep.subr.bf16.mxu0 %v2493_v59  ;;  %1200 = vmatprep.subr.bf16.mxu1 %v2494_v1  ;;  %v2595_v59 = vld [vmem:[#allocation40_spill] sm:$0xff] }
 0x13e   :  { %1160 = vmatpush2.bf16.msra.mxu0 %v2572_v27  ;;  %1201 = vmatpush2.bf16.msra.mxu1 %v2573_v28  ;;  %v2602_v27 = vld [vmem:[#allocation47_spill] sm:$0xff]  ;;  %v2603_v28 = vld [vmem:[#allocation48_spill] sm:$0xff] }
 0x13f   :  { %1161 = vmatprep.subr.bf16.mxu0 %v2574_v29  ;;  %1202 = vmatprep.subr.bf16.mxu1 %v2575_v34  ;;  %v2604_v29 = vld [vmem:[#allocation49_spill] sm:$0xff]  ;;  %v2605_v34 = vld [vmem:[#allocation50_spill] sm:$0xff] }
 0x142   :  { %1162 = vmatpush2.bf16.msra.mxu0 %v2576_v35  ;;  %1203 = vmatpush2.bf16.msra.mxu1 %v2577_v36  ;;  %v2607_v35 = vld [vmem:[#allocation52_spill] sm:$0xff]  ;;  %v2608_v36 = vld [vmem:[#allocation53_spill] sm:$0xff] }
 0x143   :  { %1163 = vmatprep.subr.bf16.mxu0 %v2578_v37  ;;  %1204 = vmatprep.subr.bf16.mxu1 %v2579_v42  ;;  %v2609_v37 = vld [vmem:[#allocation54_spill] sm:$0xff]  ;;  %v2610_v42 = vld [vmem:[#allocation55_spill] sm:$0xff] }
 0x146   :  { %1164 = vmatpush2.bf16.msra.mxu0 %v2581_v45  ;;  %1205 = vmatpush2.bf16.msra.mxu1 %v2582_v50  ;;  %v2613_v45 = vld [vmem:[#allocation58_spill] sm:$0xff]  ;;  %v2614_v50 = vld [vmem:[#allocation59_spill] sm:$0xff] }
 0x147   :  { %1165 = vmatprep.subr.bf16.mxu0 %v2583_v51  ;;  %1206 = vmatprep.subr.bf16.mxu1 %v2584_v52  ;;  %v2615_v51 = vld [vmem:[#allocation60_spill] sm:$0xff]  ;;  %v2616_v52 = vld [vmem:[#allocation61_spill] sm:$0xff] }
 0x14a   :  { %1166 = vmatpush2.bf16.msra.mxu0 %v2586_v62  ;;  %1207 = vmatpush2.bf16.msra.mxu1 %v2587_v63  ;;  %v2619_v62 = vld [vmem:[#allocation64_spill] sm:$0xff]  ;;  %v2620_v63 = vld [vmem:[#allocation65_spill] sm:$0xff] }
 0x14b   :  { %1167 = vmatprep.subr.bf16.mxu0 %v2588_v0  ;;  %1208 = vmatprep.subr.bf16.mxu1 %v2589_v11  ;;  %v2621_v0 = vld [vmem:[#allocation66_spill] sm:$0xff]  ;;  %v2622_v11 = vld [vmem:[#allocation67_spill] sm:$0xff] }
 0x14e   :  { %1168 = vmatpush2.bf16.msra.mxu0 %v2590_v15  ;;  %1209 = vmatpush2.bf16.msra.mxu1 %v2591_v16  ;;  %v2623_v15 = vld [vmem:[#allocation68_spill] sm:$0xff]  ;;  %v2624_v16 = vld [vmem:[#allocation69_spill] sm:$0xff] }
 0x14f   :  { %1219 = vmatprep.subr.bf16.mxu0 %v2592_v25  ;;  %1260 = vmatprep.subr.bf16.mxu1 %v2593_v30  ;;  %v2625_v25 = vld [vmem:[#allocation70_spill] sm:$0xff]  ;;  %v2626_v30 = vld [vmem:[#allocation71_spill] sm:$0xff] }
 0x151   :  { %v2132_v31 = vpop.f32.mrf.mxu0  ;;  %1170 = vmatmul.mubr.bf16.vlgmr.msra.gmra.mxu0 %v2126_v13  ;;  %v2135_v7 = vpop.f32.mrf.mxu1  ;;  %1211 = vmatmul.mubr.bf16.vlgmr.msra.gmra.mxu1 %v2126_v13 }
 0x152   :  { %1220 = vmatpush1.bf16.msra.mxu0 %v2594_v47  ;;  %1261 = vmatpush1.bf16.msra.mxu1 %v2595_v59  ;;  %v2627_v47 = vld [vmem:[#allocation72_spill] sm:$0xff]  ;;  %v2628_v59 = vld [vmem:[#allocation73_spill] sm:$0xff] }
 0x153   :  { %v2140_v1 = vpop.f32.mrf.mxu0  ;;  %1221 = vmatprep.subr.bf16.mxu0 %v2596_v8  ;;  %v2143_v49 = vpop.f32.mrf.mxu1  ;;  %1262 = vmatprep.subr.bf16.mxu1 %v2597_v5  ;;  %v2629_v8 = vld [vmem:[#allocation74_spill] sm:$0xff]  ;;  %v2630_v5 = vld [vmem:[#allocation75_spill] sm:$0xff] }
 0x154   :  { %1251 = vmatprep.mubr.bf16.mxu0 %v2050_v61  ;;  %1292 = vmatprep.mubr.bf16.mxu1 %v2050_v61  ;;  %v2606_v61 = vld [vmem:[#allocation51_spill] sm:$0xff] }
 0x155   :  { %v929_v9 = vpop.f32.mrf.mxu0  ;;  %v970_v10 = vpop.f32.mrf.mxu1 }
 0x156   :  { %1222 = vmatpush1.bf16.msra.mxu0 %v2598_v14  ;;  %1263 = vmatpush1.bf16.msra.mxu1 %v2599_v18  ;;  %v2631_v9 = vld [vmem:[#allocation79_spill] sm:$0xff]  ;;  %v2632_v10 = vld [vmem:[#allocation84_spill] sm:$0xff]  ;;  %v2633_v14 = vld [vmem:[#allocation85_spill] sm:$0xff] }
 0x157   :  { %v930_v19 = vpop.f32.mrf.mxu0  ;;  %1223 = vmatprep.subr.bf16.mxu0 %v2600_v20  ;;  %v971_v21 = vpop.f32.mrf.mxu1  ;;  %1264 = vmatprep.subr.bf16.mxu1 %v2601_v26 }
 0x15a   :  { %1224 = vmatpush1.bf16.msra.mxu0 %v2602_v27  ;;  %1265 = vmatpush1.bf16.msra.mxu1 %v2603_v28 }
 0x15b   :  { %1225 = vmatprep.subr.bf16.mxu0 %v2604_v29  ;;  %1266 = vmatprep.subr.bf16.mxu1 %v2605_v34 }
 0x15e   :  { %1226 = vmatpush1.bf16.msra.mxu0 %v2606_v61  ;;  %1267 = vmatpush1.bf16.msra.mxu1 %v2607_v35 }
 0x15f   :  { %1227 = vmatprep.subr.bf16.mxu0 %v2608_v36  ;;  %1268 = vmatprep.subr.bf16.mxu1 %v2609_v37 }
 0x162   :  { %1228 = vmatpush1.bf16.msra.mxu0 %v2610_v42  ;;  %1269 = vmatpush1.bf16.msra.mxu1 %v2611_v43 }
 0x163   :  { %1229 = vmatprep.subr.bf16.mxu0 %v2612_v44  ;;  %1270 = vmatprep.subr.bf16.mxu1 %v2613_v45 }
 0x166   :  { %1230 = vmatpush1.bf16.msra.mxu0 %v2614_v50  ;;  %1271 = vmatpush1.bf16.msra.mxu1 %v2615_v51 }
 0x167   :  { %1231 = vmatprep.subr.bf16.mxu0 %v2616_v52  ;;  %1272 = vmatprep.subr.bf16.mxu1 %v2617_v54 }
 0x16a   :  { %1232 = vmatpush1.bf16.msra.mxu0 %v2618_v60  ;;  %1273 = vmatpush1.bf16.msra.mxu1 %v2619_v62 }
 0x16b   :  { %1233 = vmatprep.subr.bf16.mxu0 %v2620_v63  ;;  %1274 = vmatprep.subr.bf16.mxu1 %v2621_v0 }
 0x16e   :  { %1234 = vmatpush1.bf16.msra.mxu0 %v2622_v11  ;;  %1275 = vmatpush1.bf16.msra.mxu1 %v2623_v15 }
 0x16f   :  { %1235 = vmatprep.subr.bf16.mxu0 %v2624_v16  ;;  %1276 = vmatprep.subr.bf16.mxu1 %v2625_v25 }
 0x172   :  { %1236 = vmatpush2.bf16.msra.mxu0 %v2626_v30  ;;  %1277 = vmatpush2.bf16.msra.mxu1 %v2627_v47 }
 0x173   :  { %1237 = vmatprep.subr.bf16.mxu0 %v2628_v59  ;;  %1278 = vmatprep.subr.bf16.mxu1 %v2629_v8 }
 0x176   :  { %1238 = vmatpush2.bf16.msra.mxu0 %v2630_v5  ;;  %1279 = vmatpush2.bf16.msra.mxu1 %v2551_v40  ;;  %v2634_v40 = vld [vmem:[#allocation87_spill] sm:$0xff] }
 0x177   :  { %1239 = vmatprep.subr.bf16.mxu0 %v2552_v48  ;;  %1280 = vmatprep.subr.bf16.mxu1 %v2553_v58  ;;  %v2635_v48 = vld [vmem:[#allocation88_spill] sm:$0xff] }
 0x17a   :  { %1240 = vmatpush2.bf16.msra.mxu0 %v2631_v9  ;;  %1281 = vmatpush2.bf16.msra.mxu1 %v2555_v46  ;;  %v2637_v46 = vld [vmem:[#allocation90_spill] sm:$0xff] }
 0x17b   :  { %1241 = vmatprep.subr.bf16.mxu0 %v2556_v56  ;;  %1282 = vmatprep.subr.bf16.mxu1 %v2557_v33 }
 0x17e   :  { %1242 = vmatpush2.bf16.msra.mxu0 %v2558_v32  ;;  %1283 = vmatpush2.bf16.msra.mxu1 %v2632_v10  ;;  %v2636_v32 = vld [vmem:[#allocation89_spill] sm:$0xff] }
 0x17f   :  { %1243 = vmatprep.subr.bf16.mxu0 %v2633_v14  ;;  %1284 = vmatprep.subr.bf16.mxu1 %v2561_v57 }
 0x182   :  { %1244 = vmatpush2.bf16.msra.mxu0 %v1865_v53  ;;  %1285 = vmatpush2.bf16.msra.mxu1 %v1869_v23 }
 0x183   :  { %1245 = vmatprep.subr.bf16.mxu0 %v2634_v40  ;;  %1286 = vmatprep.subr.bf16.mxu1 %v2635_v48 }
 0x186   :  { %1246 = vmatpush2.bf16.msra.mxu0 %v1877_v38  ;;  %1287 = vmatpush2.bf16.msra.mxu1 %v1881_v39 }
 0x187   :  { %1247 = vmatprep.subr.bf16.mxu0 %v1883_v55  ;;  %1288 = vmatprep.subr.bf16.mxu1 %v2636_v32 }
 0x18a   :  { %1248 = vmatpush2.bf16.msra.mxu0 %v1889_v4  ;;  %1289 = vmatpush2.bf16.msra.mxu1 %v2637_v46 }
 0x18b   :  { %1249 = vmatprep.subr.bf16.mxu0 %v1895_v2  ;;  %1290 = vmatprep.subr.bf16.mxu1 %v1898_v6 }
 0x18e   :  { %1250 = vmatpush2.bf16.msra.mxu0 %v1901_v24  ;;  %1291 = vmatpush2.bf16.msra.mxu1 %v1905_v12 }
 0x191   :  { %v1007_v33 = vpop.f32.mrf.mxu0  ;;  %1252 = vmatmul.mubr.bf16.vlgmr.msra.gmra.mxu0 %v2126_v13  ;;  %v1048_v53 = vpop.f32.mrf.mxu1  ;;  %1293 = vmatmul.mubr.bf16.vlgmr.msra.gmra.mxu1 %v2126_v13 }
 0x192   :  { %v1008_v20 = vadd.f32 %v1007_v33, %v2052_v41  ;;  %v1049_v21 = vadd.f32 %v1048_v53, %v2055_v22 }
 0x193   :  { %v1009_v23 = vpop.f32.mrf.mxu0  ;;  %v1050_v38 = vpop.f32.mrf.mxu1 }
 0x194   :  { %v1010_v13 = vadd.f32 %v1009_v23, %v2060_v17  ;;  %v1051_v29 = vadd.f32 %v1050_v38, %v2063_v3 }
 0x195   :  { %v1011_v39 = vpop.f32.mrf.mxu0  ;;  %v1052_v55 = vpop.f32.mrf.mxu1 }
 0x197   :  { %v1012_v4 = vpop.f32.mrf.mxu0  ;;  %v1053_v58 = vpop.f32.mrf.mxu1 }
 0x1d1   :  { %v1089_v56 = vpop.f32.mrf.mxu0  ;;  %v1130_v2 = vpop.f32.mrf.mxu1 }
 0x1d2   :  { %v1090_v42 = vadd.f32 %v1089_v56, %v2132_v31  ;;  %v1131_v43 = vadd.f32 %v1130_v2, %v2135_v7 }
 0x1d3   :  { %v1091_v57 = vpop.f32.mrf.mxu0  ;;  %v1132_v6 = vpop.f32.mrf.mxu1 }
 0x1d4   :  { %v1092_v45 = vadd.f32 %v1091_v57, %v2140_v1  ;;  %v1133_v52 = vadd.f32 %v1132_v6, %v2143_v49 }
 0x1d5   :  { %v1093_v18 = vpop.f32.mrf.mxu0  ;;  %v1134_v24 = vpop.f32.mrf.mxu1 }
 0x1d7   :  { %v1094_v19 = vpop.f32.mrf.mxu0  ;;  %v1135_v12 = vpop.f32.mrf.mxu1 }
 0x211   :  { %v1171_v26 = vpop.f32.mrf.mxu0  ;;  %v1212_v28 = vpop.f32.mrf.mxu1 }
 0x212   :  { %v1301_v27 = vadd.f32 %v1171_v26, %v1008_v20  ;;  %v1303_v34 = vadd.f32 %v1212_v28, %v1049_v21 }
 0x213   :  { %v1173_v61 = vpop.f32.mrf.mxu0  ;;  %v1214_v36 = vpop.f32.mrf.mxu1 }
 0x214   :  { %1309 = vst [vmem:[%s2242_s2] sm:$0xff] %v1301_v27  ;;  %v1302_v35 = vadd.f32 %v1173_v61, %v1010_v13  ;;  %1311 = vst [vmem:[%s2242_s2 + $0x10] sm:$0xff] %v1303_v34  ;;  %v1304_v22 = vadd.f32 %v1214_v36, %v1051_v29 }
 0x215   :  { %v1175_v41 = vpop.f32.mrf.mxu0  ;;  %v1216_v17 = vpop.f32.mrf.mxu1 }
 0x216   :  { %1310 = vst [vmem:[%s2242_s2 + $0x8] sm:$0xff] %v1302_v35  ;;  %1312 = vst [vmem:[%s2242_s2 + $0x18] sm:$0xff] %v1304_v22 }
 0x217   :  { %v1176_v3 = vpop.f32.mrf.mxu0  ;;  %v1217_v37 = vpop.f32.mrf.mxu1 }
 0x251   :  { %v1253_v44 = vpop.f32.mrf.mxu0  ;;  %v1294_v51 = vpop.f32.mrf.mxu1 }
 0x252   :  { %v1305_v50 = vadd.f32 %v1253_v44, %v1090_v42  ;;  %v1307_v54 = vadd.f32 %v1294_v51, %v1131_v43 }
 0x253   :  { %v1255_v60 = vpop.f32.mrf.mxu0  ;;  %v1296_v63 = vpop.f32.mrf.mxu1 }
 0x254   :  { %1313 = vst [vmem:[%s2242_s2 + $0x20] sm:$0xff] %v1305_v50  ;;  %v1306_v62 = vadd.f32 %v1255_v60, %v1092_v45  ;;  %1315 = vst [vmem:[%s2242_s2 + $0x30] sm:$0xff] %v1307_v54  ;;  %v1308_v31 = vadd.f32 %v1296_v63, %v1133_v52 }
 0x255   :  { %v1257_v7 = vpop.f32.mrf.mxu0  ;;  %v1298_v1 = vpop.f32.mrf.mxu1 }
 0x256   :  { %1314 = vst [vmem:[%s2242_s2 + $0x28] sm:$0xff] %v1306_v62  ;;  %1316 = vst [vmem:[%s2242_s2 + $0x38] sm:$0xff] %v1308_v31 }
 0x257   :  { %v1258_v49 = vpop.f32.mrf.mxu0  ;;  %v1299_v0 = vpop.f32.mrf.mxu1 }
 0x258   :  { %1321 = vsyncpa [#allocation3], 1 }

</bundles_post_ra>
